<compile_context>
chip_gen: v7x
topology: tpu7x:2x2x1
jax: 0.10.0
libtpu: 0.0.40
codegen_flags: <defaults>
</compile_context>

<pallas_src>
import functools

import jax
import jax.numpy as jnp
from jax.experimental import pallas as pl
from jax.experimental.pallas import tpu as pltpu


def _round_up(x, m):
    return (x + m - 1) // m * m


# --------------------------------------------------------------------------- #
# Kernel
# --------------------------------------------------------------------------- #
def encoder_kernel(x_ref,
                   w1_ref, b1_ref, w2_ref, b2_ref,
                   w3_ref, b3_ref, w4_ref, b4_ref,
                   o_ref, *, compute_dtype, precision):
    # Full-precision copy of the input tile for the residual add / norm.
    x_f32 = x_ref[...].astype(jnp.float32)
    x_c = x_ref[...].astype(compute_dtype)

    # --- seq1: Linear -> ReLU -> Linear (MXU, f32 accumulation) ---
    h1 = jnp.dot(x_c, w1_ref[...], preferred_element_type=jnp.float32,
                 precision=precision) + b1_ref[...]
    h1 = jnp.maximum(h1, 0.0)
    y = jnp.dot(h1.astype(compute_dtype), w2_ref[...],
                preferred_element_type=jnp.float32,
                precision=precision) + b2_ref[...]

    # Residual + L2 normalize along the last dim (padded cols are exactly zero,
    # so the norm over the padded width equals the norm over the real width).
    y = y + x_f32
    ss1 = jnp.maximum(jnp.sum(y * y, axis=-1, keepdims=True), 1e-12)
    y = y * jax.lax.rsqrt(ss1)          # rsqrt -> EUP slot; sum -> XLU slot

    # --- seq2: Linear -> ReLU -> Linear ---
    h2 = jnp.dot(y.astype(compute_dtype), w3_ref[...],
                 preferred_element_type=jnp.float32,
                 precision=precision) + b3_ref[...]
    h2 = jnp.maximum(h2, 0.0)
    z = jnp.dot(h2.astype(compute_dtype), w4_ref[...],
                preferred_element_type=jnp.float32,
                precision=precision) + b4_ref[...]

    # L2 normalize along the last dim.
    ss2 = jnp.maximum(jnp.sum(z * z, axis=-1, keepdims=True), 1e-12)
    o_ref[...] = (z * jax.lax.rsqrt(ss2)).astype(o_ref.dtype)


# --------------------------------------------------------------------------- #
# One-time parameter preparation (hoisted out of the per-call path)
# --------------------------------------------------------------------------- #
def prepare_params(params, *, compute_dtype=jnp.bfloat16, lane_align=128):
    """Transpose/pad/cast PyTorch-convention Linear params once."""
    H, D = params["w1"].shape            # (hidden, input) PyTorch convention
    Dp = _round_up(D, lane_align)
    Hp = _round_up(H, lane_align)

    def pad_w(w_t, rows, cols):          # w_t already transposed to (in, out)
        return jnp.pad(w_t, ((0, rows - w_t.shape[0]),
                             (0, cols - w_t.shape[1]))).astype(compute_dtype)

    def pad_b(b, cols):
        return jnp.pad(b, (0, cols - b.shape[0])).reshape(1, cols).astype(jnp.float32)

    prep = dict(
        w1=pad_w(params["w1"].T, Dp, Hp), b1=pad_b(params["b1"], Hp),
        w2=pad_w(params["w2"].T, Hp, Dp), b2=pad_b(params["b2"], Dp),
        w3=pad_w(params["w3"].T, Dp, Hp), b3=pad_b(params["b3"], Hp),
        w4=pad_w(params["w4"].T, Hp, Dp), b4=pad_b(params["b4"], Dp),
        D=D, H=H, Dp=Dp, Hp=Hp, compute_dtype=compute_dtype,
    )
    return prep


# --------------------------------------------------------------------------- #
# Tiling / VMEM heuristics
# --------------------------------------------------------------------------- #
def _vmem_budget_bytes():
    try:
        cap = pltpu.get_tpu_info().vmem_capacity_bytes
    except Exception:
        cap = 64 * 1024 * 1024           # v7x lower bound
    return int(0.75 * cap)


def _working_set_bytes(bb, Dp, Hp, w_itemsize, x_itemsize, out_itemsize):
    # Single-buffered resident weights + biases.
    weights = 4 * Dp * Hp * w_itemsize + 2 * (Hp + Dp) * 4
    # Double-buffered x / out tiles.
    io = 2 * bb * Dp * x_itemsize + 2 * bb * Dp * out_itemsize
    # Live f32 intermediates (h1/h2 at width Hp, y/z at width Dp).
    interm = 2 * bb * Hp * 4 + 2 * bb * Dp * 4
    return weights + io + interm


def _choose_batch_tiling(B, block_b):
    """Balanced tiles, small padding, even step count for v7x's two TCs."""
    if B <= 8:
        return _round_up(max(B, 1), 8), 1
    num_steps = max(pl.cdiv(B, block_b), 2)
    if num_steps % 2:                    # keep both v7x TensorCores busy
        num_steps += 1
    bb = _round_up(pl.cdiv(B, num_steps), 8)
    # Prefer full 128-row MXU passes when it costs < one extra 128-row tile.
    bb128 = _round_up(bb, 128)
    if num_steps * bb128 - B < 128:
        bb = bb128
    return bb, num_steps


# --------------------------------------------------------------------------- #
# Forward wrapper
# --------------------------------------------------------------------------- #
def encoder_forward(x, prep, *, block_b=256):
    """x: (B, input_size) f32.  prep: output of prepare_params()."""
    B, D = x.shape
    assert D == prep["D"]
    Dp, Hp = prep["Dp"], prep["Hp"]
    compute_dtype = prep["compute_dtype"]
    out_dtype = x.dtype

    # Exact path uses HIGHEST precision so f32 matmuls aren't bf16-decomposed.
    precision = (jax.lax.Precision.HIGHEST
                 if compute_dtype == jnp.float32 else None)
    # bf16 path: DMA x in bf16 (half the input traffic / double-buffer VMEM).
    x_dma_dtype = jnp.bfloat16 if compute_dtype == jnp.bfloat16 else x.dtype

    w_itemsize = jnp.dtype(compute_dtype).itemsize
    x_itemsize = jnp.dtype(x_dma_dtype).itemsize
    out_itemsize = jnp.dtype(out_dtype).itemsize

    budget = _vmem_budget_bytes()
    bb, num_steps = _choose_batch_tiling(B, block_b)
    # Shrink the batch tile if the working set would overflow this chip's VMEM.
    while bb > 8 and _working_set_bytes(bb, Dp, Hp, w_itemsize,
                                        x_itemsize, out_itemsize) > budget:
        bb = max(8, _round_up(bb // 2, 8))
    num_steps = pl.cdiv(B, bb)
    Bp = num_steps * bb

    x_p = jnp.pad(x, ((0, Bp - B), (0, Dp - D))).astype(x_dma_dtype)

    x_spec = pl.BlockSpec((bb, Dp), lambda i: (i, 0))
    o_spec = pl.BlockSpec((bb, Dp), lambda i: (i, 0))

    def resident_spec(shape):
        # Constant index_map -> fetched once, stays VMEM-resident; Buffered(1)
        # single-buffers it (double-buffering a never-changing block is waste).
        try:
            return pl.BlockSpec(shape, lambda i: (0, 0),
                                pipeline_mode=pl.Buffered(1))
        except TypeError:
            return pl.BlockSpec(shape, lambda i: (0, 0))

    kernel = functools.partial(encoder_kernel,
                               compute_dtype=compute_dtype,
                               precision=precision)

    out = pl.pallas_call(
        kernel,
        out_shape=jax.ShapeDtypeStruct((Bp, Dp), out_dtype),
        grid_spec=pltpu.PrefetchScalarGridSpec(
            num_scalar_prefetch=0,
            grid=(num_steps,),
            in_specs=[
                x_spec,
                resident_spec((Dp, Hp)), resident_spec((1, Hp)),
                resident_spec((Hp, Dp)), resident_spec((1, Dp)),
                resident_spec((Dp, Hp)), resident_spec((1, Hp)),
                resident_spec((Hp, Dp)), resident_spec((1, Dp)),
            ],
            out_specs=o_spec,
        ),
        compiler_params=pltpu.CompilerParams(
            dimension_semantics=("parallel",),
            vmem_limit_bytes=budget,
        ),
    )(x_p, prep["w1"], prep["b1"], prep["w2"], prep["b2"],
      prep["w3"], prep["b3"], prep["w4"], prep["b4"])

    return out[:B, :D]


# --------------------------------------------------------------------------- #
# Reference & test
# --------------------------------------------------------------------------- #
def init_params(key, input_size, hidden_size):
    """Deterministic synthetic parameters, PyTorch nn.Linear shape convention."""
    ks = jax.random.split(key, 8)

    def lin(kw, kb, fan_in, fan_out):
        bound = 1.0 / jnp.sqrt(fan_in)
        w = jax.random.uniform(kw, (fan_out, fan_in), jnp.float32, -bound, bound)
        b = jax.random.uniform(kb, (fan_out,), jnp.float32, -bound, bound)
        return w, b

    w1, b1 = lin(ks[0], ks[1], input_size, hidden_size)
    w2, b2 = lin(ks[2], ks[3], hidden_size, input_size)
    w3, b3 = lin(ks[4], ks[5], input_size, hidden_size)
    w4, b4 = lin(ks[6], ks[7], hidden_size, input_size)
    return dict(w1=w1, b1=b1, w2=w2, b2=b2, w3=w3, b3=b3, w4=w4, b4=b4)


def encoder_reference(x, p):
    """Pure-JAX f32 reference mirroring the PyTorch module."""
    h = jnp.maximum(x @ p["w1"].T + p["b1"], 0.0) @ p["w2"].T + p["b2"]
    y = h + x
    y = y / jnp.linalg.norm(y, axis=-1, keepdims=True)
    z = jnp.maximum(y @ p["w3"].T + p["b3"], 0.0) @ p["w4"].T + p["b4"]
    return z / jnp.linalg.norm(z, axis=-1, keepdims=True)


if __name__ == "__main__":
    key = jax.random.PRNGKey(0)
    k_x, k_p = jax.random.split(key)

    batch, input_size, hidden_size = 16, 32, 64
    x = jax.random.normal(k_x, (batch, input_size), jnp.float32)
    params = init_params(k_p, input_size, hidden_size)

    ref = encoder_reference(x, params)

    # Exact-precision path (f32 MXU operands, HIGHEST precision): tight check.
    prep_f32 = prepare_params(params, compute_dtype=jnp.float32)
    out_f32 = jax.block_until_ready(encoder_forward(x, prep_f32))
    assert out_f32.shape == (batch, input_size)
    assert jnp.allclose(out_f32, ref, atol=1e-5, rtol=1e-5)

    # Performance path (bf16 MXU operands + bf16 x DMA, f32 accumulation).
    prep_bf16 = prepare_params(params, compute_dtype=jnp.bfloat16)
    out_bf16 = jax.block_until_ready(encoder_forward(x, prep_bf16))
    assert out_bf16.shape == (batch, input_size)
    assert jnp.allclose(out_bf16, ref, atol=3e-2, rtol=3e-2)

    print("KERNEL_OK")
</pallas_src>

<mosaic_0001>
module attributes {stable_mosaic.version = 11 : i64} {
  func.func @encoder_kernel(%arg0: i32, %arg1: memref<8x128xf32, #tpu.memory_space<vmem>>, %arg2: memref<128x128xf32, #tpu.memory_space<vmem>>, %arg3: memref<1x128xf32, #tpu.memory_space<vmem>>, %arg4: memref<128x128xf32, #tpu.memory_space<vmem>>, %arg5: memref<1x128xf32, #tpu.memory_space<vmem>>, %arg6: memref<128x128xf32, #tpu.memory_space<vmem>>, %arg7: memref<1x128xf32, #tpu.memory_space<vmem>>, %arg8: memref<128x128xf32, #tpu.memory_space<vmem>>, %arg9: memref<1x128xf32, #tpu.memory_space<vmem>>, %arg10: memref<8x128xf32, #tpu.memory_space<vmem>>) attributes {dimension_semantics = [#tpu.dimension_semantics<parallel>], iteration_bounds = array<i64: 2>, scalar_prefetch = 0 : i64, scratch_operands = 0 : i64, tpu.core_type = #tpu.core_type<tc>, window_params = [{transform_indices = @transform_0, window_bounds = array<i64: 8, 128>}, {pipeline_mode = #tpu.pipeline_mode<synchronous>, transform_indices = @transform_1, window_bounds = array<i64: 128, 128>}, {pipeline_mode = #tpu.pipeline_mode<synchronous>, transform_indices = @transform_2, window_bounds = array<i64: 1, 128>}, {pipeline_mode = #tpu.pipeline_mode<synchronous>, transform_indices = @transform_3, window_bounds = array<i64: 128, 128>}, {pipeline_mode = #tpu.pipeline_mode<synchronous>, transform_indices = @transform_4, window_bounds = array<i64: 1, 128>}, {pipeline_mode = #tpu.pipeline_mode<synchronous>, transform_indices = @transform_5, window_bounds = array<i64: 128, 128>}, {pipeline_mode = #tpu.pipeline_mode<synchronous>, transform_indices = @transform_6, window_bounds = array<i64: 1, 128>}, {pipeline_mode = #tpu.pipeline_mode<synchronous>, transform_indices = @transform_7, window_bounds = array<i64: 128, 128>}, {pipeline_mode = #tpu.pipeline_mode<synchronous>, transform_indices = @transform_8, window_bounds = array<i64: 1, 128>}, {transform_indices = @transform_9, window_bounds = array<i64: 8, 128>}]} {
    %c0 = arith.constant 0 : index
    %c0_0 = arith.constant 0 : index
    %0 = vector.load %arg1[%c0, %c0_0] : memref<8x128xf32, #tpu.memory_space<vmem>>, vector<8x128xf32>
    %c0_1 = arith.constant 0 : index
    %c0_2 = arith.constant 0 : index
    %1 = vector.load %arg1[%c0_1, %c0_2] : memref<8x128xf32, #tpu.memory_space<vmem>>, vector<8x128xf32>
    %c0_3 = arith.constant 0 : index
    %c0_4 = arith.constant 0 : index
    %2 = vector.load %arg2[%c0_3, %c0_4] : memref<128x128xf32, #tpu.memory_space<vmem>>, vector<128x128xf32>
    %cst = arith.constant dense<0.000000e+00> : vector<8x128xf32>
    %3 = tpu.matmul %1, %2, %cst {dimension_numbers = #tpu.dot_dimension_numbers<[1], [0], [0], [1], [0, 0, 1, 1], [], []>, precision = #tpu.contract_precision<fp32>} : vector<8x128xf32>, vector<128x128xf32>, vector<8x128xf32> -> vector<8x128xf32>
    %c0_5 = arith.constant 0 : index
    %c0_6 = arith.constant 0 : index
    %4 = vector.load %arg3[%c0_5, %c0_6] : memref<1x128xf32, #tpu.memory_space<vmem>>, vector<1x128xf32>
    %5 = vector.broadcast %4 : vector<1x128xf32> to vector<8x128xf32>
    %6 = arith.addf %3, %5 : vector<8x128xf32>
    %cst_7 = arith.constant 0.000000e+00 : f32
    %7 = vector.broadcast %cst_7 : f32 to vector<8x128xf32>
    %8 = arith.maximumf %6, %7 : vector<8x128xf32>
    %c0_8 = arith.constant 0 : index
    %c0_9 = arith.constant 0 : index
    %9 = vector.load %arg4[%c0_8, %c0_9] : memref<128x128xf32, #tpu.memory_space<vmem>>, vector<128x128xf32>
    %cst_10 = arith.constant dense<0.000000e+00> : vector<8x128xf32>
    %10 = tpu.matmul %8, %9, %cst_10 {dimension_numbers = #tpu.dot_dimension_numbers<[1], [0], [0], [1], [0, 0, 1, 1], [], []>, precision = #tpu.contract_precision<fp32>} : vector<8x128xf32>, vector<128x128xf32>, vector<8x128xf32> -> vector<8x128xf32>
    %c0_11 = arith.constant 0 : index
    %c0_12 = arith.constant 0 : index
    %11 = vector.load %arg5[%c0_11, %c0_12] : memref<1x128xf32, #tpu.memory_space<vmem>>, vector<1x128xf32>
    %12 = vector.broadcast %11 : vector<1x128xf32> to vector<8x128xf32>
    %13 = arith.addf %10, %12 : vector<8x128xf32>
    %14 = arith.addf %13, %0 : vector<8x128xf32>
    %15 = arith.mulf %14, %14 : vector<8x128xf32>
    %cst_13 = arith.constant dense<0.000000e+00> : vector<8xf32>
    %16 = vector.multi_reduction <add>, %15, %cst_13 [1] : vector<8x128xf32> to vector<8xf32>
    %17 = vector.shape_cast %16 : vector<8xf32> to vector<8x1xf32>
    %cst_14 = arith.constant 9.99999996E-13 : f32
    %18 = vector.broadcast %cst_14 : f32 to vector<8x1xf32>
    %19 = arith.maximumf %17, %18 : vector<8x1xf32>
    %20 = math.rsqrt %19 : vector<8x1xf32>
    %21 = vector.broadcast %20 : vector<8x1xf32> to vector<8x128xf32>
    %22 = arith.mulf %14, %21 : vector<8x128xf32>
    %c0_15 = arith.constant 0 : index
    %c0_16 = arith.constant 0 : index
    %23 = vector.load %arg6[%c0_15, %c0_16] : memref<128x128xf32, #tpu.memory_space<vmem>>, vector<128x128xf32>
    %cst_17 = arith.constant dense<0.000000e+00> : vector<8x128xf32>
    %24 = tpu.matmul %22, %23, %cst_17 {dimension_numbers = #tpu.dot_dimension_numbers<[1], [0], [0], [1], [0, 0, 1, 1], [], []>, precision = #tpu.contract_precision<fp32>} : vector<8x128xf32>, vector<128x128xf32>, vector<8x128xf32> -> vector<8x128xf32>
    %c0_18 = arith.constant 0 : index
    %c0_19 = arith.constant 0 : index
    %25 = vector.load %arg7[%c0_18, %c0_19] : memref<1x128xf32, #tpu.memory_space<vmem>>, vector<1x128xf32>
    %26 = vector.broadcast %25 : vector<1x128xf32> to vector<8x128xf32>
    %27 = arith.addf %24, %26 : vector<8x128xf32>
    %cst_20 = arith.constant 0.000000e+00 : f32
    %28 = vector.broadcast %cst_20 : f32 to vector<8x128xf32>
    %29 = arith.maximumf %27, %28 : vector<8x128xf32>
    %c0_21 = arith.constant 0 : index
    %c0_22 = arith.constant 0 : index
    %30 = vector.load %arg8[%c0_21, %c0_22] : memref<128x128xf32, #tpu.memory_space<vmem>>, vector<128x128xf32>
    %cst_23 = arith.constant dense<0.000000e+00> : vector<8x128xf32>
    %31 = tpu.matmul %29, %30, %cst_23 {dimension_numbers = #tpu.dot_dimension_numbers<[1], [0], [0], [1], [0, 0, 1, 1], [], []>, precision = #tpu.contract_precision<fp32>} : vector<8x128xf32>, vector<128x128xf32>, vector<8x128xf32> -> vector<8x128xf32>
    %c0_24 = arith.constant 0 : index
    %c0_25 = arith.constant 0 : index
    %32 = vector.load %arg9[%c0_24, %c0_25] : memref<1x128xf32, #tpu.memory_space<vmem>>, vector<1x128xf32>
    %33 = vector.broadcast %32 : vector<1x128xf32> to vector<8x128xf32>
    %34 = arith.addf %31, %33 : vector<8x128xf32>
    %35 = arith.mulf %34, %34 : vector<8x128xf32>
    %cst_26 = arith.constant dense<0.000000e+00> : vector<8xf32>
    %36 = vector.multi_reduction <add>, %35, %cst_26 [1] : vector<8x128xf32> to vector<8xf32>
    %37 = vector.shape_cast %36 : vector<8xf32> to vector<8x1xf32>
    %cst_27 = arith.constant 9.99999996E-13 : f32
    %38 = vector.broadcast %cst_27 : f32 to vector<8x1xf32>
    %39 = arith.maximumf %37, %38 : vector<8x1xf32>
    %40 = math.rsqrt %39 : vector<8x1xf32>
    %41 = vector.broadcast %40 : vector<8x1xf32> to vector<8x128xf32>
    %42 = arith.mulf %34, %41 : vector<8x128xf32>
    %c0_28 = arith.constant 0 : index
    %c0_29 = arith.constant 0 : index
    %43 = vector.load %arg10[%c0_28, %c0_29] : memref<8x128xf32, #tpu.memory_space<vmem>>, vector<8x128xf32>
    tpu.vector_store %arg10[%c0_28, %c0_29], %42 {strides = array<i32>} : memref<8x128xf32, #tpu.memory_space<vmem>>, vector<8x128xf32>,
    return
  }
  func.func @transform_0(%arg0: i32) -> (i32, i32) {
    %c0_i32 = arith.constant 0 : i32
    %c0_i32_0 = arith.constant 0 : i32
    return %arg0, %c0_i32 : i32, i32
  }
  func.func @transform_1(%arg0: i32) -> (i32, i32) {
    %c0_i32 = arith.constant 0 : i32
    %c0_i32_0 = arith.constant 0 : i32
    %c0_i32_1 = arith.constant 0 : i32
    return %c0_i32, %c0_i32_0 : i32, i32
  }
  func.func @transform_2(%arg0: i32) -> (i32, i32) {
    %c0_i32 = arith.constant 0 : i32
    %c0_i32_0 = arith.constant 0 : i32
    %c0_i32_1 = arith.constant 0 : i32
    return %c0_i32, %c0_i32_0 : i32, i32
  }
  func.func @transform_3(%arg0: i32) -> (i32, i32) {
    %c0_i32 = arith.constant 0 : i32
    %c0_i32_0 = arith.constant 0 : i32
    %c0_i32_1 = arith.constant 0 : i32
    return %c0_i32, %c0_i32_0 : i32, i32
  }
  func.func @transform_4(%arg0: i32) -> (i32, i32) {
    %c0_i32 = arith.constant 0 : i32
    %c0_i32_0 = arith.constant 0 : i32
    %c0_i32_1 = arith.constant 0 : i32
    return %c0_i32, %c0_i32_0 : i32, i32
  }
  func.func @transform_5(%arg0: i32) -> (i32, i32) {
    %c0_i32 = arith.constant 0 : i32
    %c0_i32_0 = arith.constant 0 : i32
    %c0_i32_1 = arith.constant 0 : i32
    return %c0_i32, %c0_i32_0 : i32, i32
  }
  func.func @transform_6(%arg0: i32) -> (i32, i32) {
    %c0_i32 = arith.constant 0 : i32
    %c0_i32_0 = arith.constant 0 : i32
    %c0_i32_1 = arith.constant 0 : i32
    return %c0_i32, %c0_i32_0 : i32, i32
  }
  func.func @transform_7(%arg0: i32) -> (i32, i32) {
    %c0_i32 = arith.constant 0 : i32
    %c0_i32_0 = arith.constant 0 : i32
    %c0_i32_1 = arith.constant 0 : i32
    return %c0_i32, %c0_i32_0 : i32, i32
  }
  func.func @transform_8(%arg0: i32) -> (i32, i32) {
    %c0_i32 = arith.constant 0 : i32
    %c0_i32_0 = arith.constant 0 : i32
    %c0_i32_1 = arith.constant 0 : i32
    return %c0_i32, %c0_i32_0 : i32, i32
  }
  func.func @transform_9(%arg0: i32) -> (i32, i32) {
    %c0_i32 = arith.constant 0 : i32
    %c0_i32_0 = arith.constant 0 : i32
    return %arg0, %c0_i32 : i32, i32
  }
}

</mosaic_0001>

<bundles_post_ra>
// kernel: tpu_custom_call.1
= control target key start
LH: loop header
LB: loop body
LE: loop exit
PB: predicated region body
PF: predicated region fallthrough
CT: control target
= control target key end

     0   :  { %s6783_s0 = inlined_call_operand.hbm [shape: f32[16,128], index: 0, kind: input, shape index: {}]   ;;  %s6784_s1 = inlined_call_operand.hbm [shape: f32[128,128], index: 1, kind: input, shape index: {}]   ;;  %s6785_s2 = inlined_call_operand.vmem [shape: f32[1,128], index: 2, kind: input, shape index: {}]   ;;  %s6786_s3 = inlined_call_operand.hbm [shape: f32[128,128], index: 3, kind: input, shape index: {}]   ;;  %s6787_s4 = inlined_call_operand.vmem [shape: f32[1,128], index: 4, kind: input, shape index: {}]   ;;  %s6788_s5 = inlined_call_operand.hbm [shape: f32[128,128], index: 5, kind: input, shape index: {}]   ;;  %s6789_s6 = inlined_call_operand.vmem [shape: f32[1,128], index: 6, kind: input, shape index: {}]   ;;  %s6790_s7 = inlined_call_operand.hbm [shape: f32[128,128], index: 7, kind: input, shape index: {}]   ;;  %s6791_s8 = inlined_call_operand.vmem [shape: f32[1,128], index: 8, kind: input, shape index: {}]   ;;  %s6792_s9 = inlined_call_operand.hbm [shape: f32[16,128], index: 9, kind: output, shape index: {}]  }
   0x1   :  { %6821 = sst [smem:[#allocation16_spill]] %s6784_s1 }
   0x2   :  { %6822 = sst [smem:[#allocation17_spill]] %s6792_s9 }
   0x3   :  { %14 = vsyncpa [#allocation3], 0 }
   0x4   :  { %16 = vsyncpa [#allocation3 + $0x1], 0 }
   0x5   :  { %17 = vsyncpa [#allocation6], 0 }
   0x6   :  { %18 = vsyncpa [#allocation9], 0 }
   0x7   :  { %19 = vsyncpa [#allocation4], 0 }
   0x8   :  { %21 = vsyncpa [#allocation4 + $0x1], 0  ;;  %s5457_s30 = smov 0   ;;  %s5459_s10 = smov 0  }
   0x9   :  { %s5461_s11 = smov 0   ;;  %s5463_s12 = smov 0  }
   0xa LB: > { %s5396_s13 = smov [#allocation5]   ;;  %s5478_s15 = sadd.s32 4294967295, %s5394_s12   ;;  %s5394_s12 = sphi %s5463_s12, %s6869_s12   ;;  %s5390_s11 = sphi %s5461_s11, %s6868_s11   ;;  %s5386_s10 = sphi %s5459_s10, %s6867_s10   ;;  %s5382_s30 = sphi %s5457_s30, %s6866_s30  }
   0xb   : > { %s264_s14 = sshll.u32 %s5396_s13, 4  ;;  %p3202_p0 = scmp.ge.s32.totalorder %s5394_s12, 1  ;;  %s5483_s14 = int_to_ptr.vmem [resolvable:$true] %s264_s14 }
   0xc   : > { %p6794_p1 = scmp.eq.s32.totalorder %s5478_s15, 0  ;;  %p252_p2 = scmp.lt.s32.totalorder %s5394_s12, 3 }
   0xd   : > { %s5397_s17 = smov [#allocation8]   ;;  %s5398_s20 = smov [#allocation7]  }
   0xe   : > { %p5485_p3 = pnand %p3202_p0, %p252_p2  ;;  %s296_s18 = sshll.u32 %s5397_s17, 4  ;;  %s5498_s18 = int_to_ptr.vmem [resolvable:$true] %s296_s18 }
   0xf   : > { %s280_s21 = sshll.u32 %s5398_s20, 4  ;;  %s6825_s1 = sld [smem:[#allocation16_spill]]  ;;  %s5500_s21 = int_to_ptr.vmem [resolvable:$true] %s280_s21 }
  0x10   : > { %s6823_s16 = scalar_select %p5485_p3, 1, 0 }
  0x11   : > { %p5102_p5 = pneg %p5485_p3 }
  0x13   : > { %p5494_p6 = pnand %p5102_p5, %p6794_p1 }
  0x15   : > { %s5178_s24 = scalar_lea.hbm %s6825_s1, 2048  ;;  %p5510_p8 = pneg %p5494_p6 }
  0x16   : > { %p5179_p7 = scmp.ne.s32.totalorder %s6825_s1, %s5178_s24  ;;  %p5185_p11 = scmp.lt.u32.totalorder %s5178_s24, %s6825_s1 }
  0x18   : > { %p5181_p9 = pnand %p5510_p8, %p5179_p7 }
  0x1a   : > { %p5182_p10 = pneg %p5181_p9 }
  0x1c   : > { %p5187_p12 = pnand %p5185_p11, %p5182_p10 }
  0x1e   : > { %5190 = shalt.err (!%p5187_p12)
}
  0x1f   : > { %s5191_s13 = scalar_lea.vmem %s5483_s14, 2048  ;;  %p5199_p5 = scmp.lt.s32.totalorder %s5483_s14, %s5483_s14 }
  0x20   : > { %p5192_p13 = scmp.ne.s32.totalorder %s5483_s14, %s5191_s13  ;;  %p5200_p4 = scmp.lt.s32.totalorder %s5191_s13, %s5191_s13 }
  0x22   : > { %p5194_p0 = pnand %p5192_p13, %p5510_p8  ;;  %p5201_p7 = por %p5200_p4, %p5199_p5 }
  0x24   : > { %p5195_p2 = pneg %p5194_p0 }
  0x26   : > { %p5202_p9 = pnand %p5201_p7, %p5195_p2 }
  0x28   : > { %5205 = shalt.err (!%p5202_p9)
}
  0x29   : > { %s5399_s17 = smov 128   ;;  %s5400_s20 = smov 8  }
  0x2a   : > { %5105 = dma.hbm_to_vmem [thread:$0]  (!%p5494_p6), %s6825_s1, 2048, %s5483_s14, [#allocation6], %s5399_s17, %s5399_s17, %s5400_s20  }
  0x2b   : > { %s5206_s26 = scalar_lea.hbm %s6788_s5, 2048 }
  0x2c   : > { %p5207_p4 = scmp.ne.s32.totalorder %s6788_s5, %s5206_s26  ;;  %p5213_p12 = scmp.lt.u32.totalorder %s5206_s26, %s6788_s5 }
  0x2e   : > { %p5209_p10 = pnand %p5207_p4, %p5510_p8 }
  0x30   : > { %p5210_p11 = pneg %p5209_p10 }
  0x32   : > { %p5215_p13 = pnand %p5213_p12, %p5210_p11 }
  0x34   : > { %5218 = shalt.err (!%p5215_p13)
}
  0x35   : > { %s5219_s14 = scalar_lea.vmem %s5498_s18, 2048  ;;  %p5227_p7 = scmp.lt.s32.totalorder %s5498_s18, %s5498_s18 }
  0x36   : > { %p5220_p0 = scmp.ne.s32.totalorder %s5498_s18, %s5219_s14  ;;  %p5228_p9 = scmp.lt.s32.totalorder %s5219_s14, %s5219_s14 }
  0x38   : > { %p5222_p2 = pnand %p5220_p0, %p5510_p8  ;;  %p5229_p4 = por %p5228_p9, %p5227_p7 }
  0x3a   : > { %p5223_p5 = pneg %p5222_p2 }
  0x3c   : > { %p5230_p10 = pnand %p5229_p4, %p5223_p5 }
  0x3e   : > { %5233 = shalt.err (!%p5230_p10)
}
  0x3f   : > { %5111 = dma.hbm_to_vmem [thread:$0]  (!%p5494_p6), %s6788_s5, 2048, %s5498_s18, [#allocation9], %s5399_s17, %s5399_s17, %s5400_s20  }
  0x40   : > { %s5234_s25 = scalar_lea.hbm %s6786_s3, 2048 }
  0x41   : > { %p5235_p11 = scmp.ne.s32.totalorder %s6786_s3, %s5234_s25  ;;  %p5241_p0 = scmp.lt.u32.totalorder %s5234_s25, %s6786_s3 }
  0x43   : > { %p5237_p12 = pnand %p5235_p11, %p5510_p8 }
  0x45   : > { %p5238_p13 = pneg %p5237_p12 }
  0x47   : > { %p5243_p2 = pnand %p5241_p0, %p5238_p13 }
  0x49   : > { %5246 = shalt.err (!%p5243_p2)
}
  0x4a   : > { %s5247_s18 = scalar_lea.vmem %s5500_s21, 2048  ;;  %p5255_p4 = scmp.lt.s32.totalorder %s5500_s21, %s5500_s21 }
  0x4b   : > { %p5248_p5 = scmp.ne.s32.totalorder %s5500_s21, %s5247_s18  ;;  %p5256_p10 = scmp.lt.s32.totalorder %s5247_s18, %s5247_s18 }
  0x4d   : > { %p5250_p7 = pnand %p5248_p5, %p5510_p8  ;;  %p5257_p11 = por %p5256_p10, %p5255_p4 }
  0x4f   : > { %p5251_p9 = pneg %p5250_p7 }
  0x51   : > { %p5258_p12 = pnand %p5257_p11, %p5251_p9 }
  0x53   : > { %5261 = shalt.err (!%p5258_p12)
}
  0x54   : > { %5108 = dma.hbm_to_vmem [thread:$0]  (!%p5494_p6), %s6786_s3, 2048, %s5500_s21, [#allocation6], %s5399_s17, %s5399_s17, %s5400_s20  }
  0x55   : > { %s5401_s22 = smov [#allocation10]   ;;  %s5262_s26 = scalar_lea.hbm %s6790_s7, 2048 }
  0x56   : > { %s312_s23 = sshll.u32 %s5401_s22, 4  ;;  %p5263_p13 = scmp.ne.s32.totalorder %s6790_s7, %s5262_s26  ;;  %s313_s23 = int_to_ptr.vmem [resolvable:$true] %s312_s23 }
  0x57   : > { %p5269_p5 = scmp.lt.u32.totalorder %s5262_s26, %s6790_s7 }
  0x58   : > { %p5265_p0 = pnand %p5263_p13, %p5510_p8 }
  0x5a   : > { %p5266_p2 = pneg %p5265_p0 }
  0x5c   : > { %p5271_p7 = pnand %p5269_p5, %p5266_p2 }
  0x5e   : > { %5274 = shalt.err (!%p5271_p7)
}
  0x5f   : > { %s5275_s21 = scalar_lea.vmem %s313_s23, 2048  ;;  %p5283_p11 = scmp.lt.s32.totalorder %s313_s23, %s313_s23 }
  0x60   : > { %p5276_p9 = scmp.ne.s32.totalorder %s313_s23, %s5275_s21  ;;  %p5284_p12 = scmp.lt.s32.totalorder %s5275_s21, %s5275_s21 }
  0x62   : > { %p5278_p4 = pnand %p5276_p9, %p5510_p8  ;;  %p5285_p1 = por %p5284_p12, %p5283_p11 }
  0x64   : > { %p5279_p10 = pneg %p5278_p4 }
  0x66   : > { %p5286_p3 = pnand %p5285_p1, %p5279_p10 }
  0x68   : > { %5289 = shalt.err (!%p5286_p3)
}
  0x69   : > { %5114 = dma.hbm_to_vmem [thread:$0]  (!%p5494_p6), %s6790_s7, 2048, %s313_s23, [#allocation9], %s5399_s17, %s5399_s17, %s5400_s20  }
  0x6a   : > { %s3201_s19 = sadd.s32 4294967294, %s5394_s12   ;;  %s5609_s27 = sadd.s32 1, %s5394_s12  }
  0x6b   : > { %s31_s22 = ssub.s32 %s5394_s12, %s5609_s27  ;;  %s34_s24 = sadd.s32 1, %s5390_s11 }
  0x6c   : > { %p32_p1 = scmp.eq.s32.totalorder %s31_s22, 0  ;;  %p41_p3 = scmp.ne.s32.totalorder %s5390_s11, %s5386_s10 }
  0x6d   : > { %p42_p8 = scmp.eq.s32.totalorder %s5394_s12, 0  ;;  %p47_p13 = scmp.ne.s32.totalorder %s5386_s10, %s5382_s30 }
  0x6e   : > { %s5620_s25 = scalar_select %p32_p1, %s5390_s11, %s34_s24  }
  0x6f   : > { %p5622_p0 = por %p42_p8, %p41_p3  ;;  %p6828_p2 = scmp.eq.s32.totalorder %s5478_s15, 0 }
  0x70   : > { %p239_p5 = scmp.eq.s32.totalorder %s5478_s15, 1  ;;  %p245_p7 = scmp.eq.s32.totalorder %s3201_s19, 1 }
  0x71   : > { %p5628_p6 = por %p6828_p2, %p47_p13  ;;  %p5127_p9 = scmp.lt.s32.totalorder %s5394_s12, 2 }
  0x72   : > { %s329_s20 = sand.u32 1, %s5390_s11   ;;  %p5635_p4 = por %p239_p5, %p41_p3 }
  0x73   : > { %p5639_p10 = por %p245_p7, %p47_p13  ;;  %s3208_s29 = sshll.u32 %s329_s20, 3 }
  0x74   : > { %s6830_s23 = scalar_select %p5635_p4, 1, 0 }
  0x75   : > { %s6831_s28 = scalar_select %p5639_p10, 1, 0 }
  0x76   : > { %s3209_s13 = sshll.u32 %s5394_s12, 7  ;;  %s333_s9 = scalar_lea.vmem [#allocation2], %s3208_s29 }
  0x77   : > { %s5647_s14 = scalar_lea.hbm %s6783_s0, %s3209_s13  ;;  %s340_s19 = sshll.u32 %s333_s9, 4  ;;  %s5649_s19 = int_to_ptr.vmem [resolvable:$true] %s340_s19 }
  0x78   : > { %p5653_p11 = pnand %p5127_p9, %p5622_p0  ;;  %s330_s24 = scalar_lea.sflag [#allocation3], %s329_s20 }
  0x79   : > { %s5290_s1 = scalar_lea.hbm %s5647_s14, 128  ;;  %s5295_s18 = scalar_lea.hbm %s6783_s0, 256 }
  0x7a   : > { %p5291_p12 = scmp.ne.s32.totalorder %s5647_s14, %s5290_s1  ;;  %p5292_p1 = pneg %p5653_p11 }
  0x7b   : > { %p5296_p13 = scmp.lt.u32.totalorder %s5647_s14, %s6783_s0  ;;  %p5297_p0 = scmp.lt.u32.totalorder %s5295_s18, %s5290_s1 }
  0x7c   : > { %p5293_p3 = pnand %p5292_p1, %p5291_p12  ;;  %p5299_p5 = scmp.lt.u32.totalorder %s5290_s1, %s5647_s14 }
  0x7d   : > { %p5298_p2 = por %p5297_p0, %p5296_p13 }
  0x7e   : > { %p5294_p8 = pneg %p5293_p3 }
  0x7f   : > { %p5300_p7 = por %p5299_p5, %p5298_p2 }
  0x81   : > { %p5301_p9 = pnand %p5300_p7, %p5294_p8 }
  0x83   : > { %5304 = shalt.err (!%p5301_p9)
}
  0x84   : > { %s5305_s20 = scalar_lea.vmem %s5649_s19, 128  ;;  %s5402_s9 = smov [#allocation2]  }
  0x85   : > { %p5306_p12 = scmp.ne.s32.totalorder %s5649_s19, %s5305_s20  ;;  %s5310_s29 = sshll.u32 %s5402_s9, 4  ;;  %s5311_s29 = int_to_ptr.vmem [resolvable:$false] %s5310_s29 }
  0x86   : > { %s5312_s13 = scalar_lea.vmem %s5311_s29, 256  ;;  %p5313_p4 = scmp.lt.s32.totalorder %s5649_s19, %s5311_s29 }
  0x87   : > { %p5308_p3 = pnand %p5306_p12, %p5292_p1  ;;  %p5314_p13 = scmp.lt.s32.totalorder %s5312_s13, %s5305_s20 }
  0x89   : > { %p5309_p10 = pneg %p5308_p3  ;;  %p5315_p0 = por %p5314_p13, %p5313_p4 }
  0x8b   : > { %p5316_p2 = pnand %p5315_p0, %p5309_p10 }
  0x8d   : > { %5319 = shalt.err (!%p5316_p2)
}
  0x8e   : > { %5118 = dma.hbm_to_vmem [thread:$0]  (!%p5653_p11), %s5647_s14, 128, %s5649_s19, %s330_s24  }
  0x8f   : > { %p6833_p8 = scmp.ne.s32.totalorder %s6823_s16, 0 }
  0x90   : > { %s5685_s1 = sand.u32 (!%p6833_p8), 1, %s5386_s10  }
  0x91   : > { %349 = sbr.rel (%p6833_p8) target bundleno = 2059 (0x80b), region = 56  ;;  %s3211_s18 = sshll.u32 (!%p6833_p8), %s5685_s1, 3 }
  0x92   : > { %s352_s26 = scalar_lea.sflag (!%p6833_p8), [#allocation3], %s5685_s1  ;;  %s5691_s21 = scalar_lea.vmem (!%p6833_p8), [#allocation2], %s3211_s18 }
  0x98   : > { %5365 = dma.done.wait (%p5628_p6), %s352_s26, 128  }
  0x99   : > { %5367 = vsyncadd (%p5628_p6), %s352_s26, 4294967168  ;;  %p6834_p4 = scmp.eq.s32.totalorder %s5478_s15, 0 }
  0x9b   : > { %5369 = dma.done.wait (%p6834_p4), [#allocation6], 4096   ;;  %p6835_p10 = pmov %p6834_p4 }
  0x9c   : > { %p6836_p11 = pmov %p6834_p4 }
  0x9d   : > { %5371 = vsyncadd (%p6835_p10), [#allocation6], 4294963200 }
  0x9e   : > { %5373 = dma.done.wait (%p6836_p11), [#allocation9], 4096   ;;  %p6837_p1 = pmov %p6834_p4 }
  0x9f   : > { %v5403_v0 = vmov 0.0|0.0   ;;  %vm5404_vm0 = vmmov 0   ;;  %v5405_v1 = vmov 0.0   ;;  %v407_v2 = vld [vmem:[#allocation5] sm:$0xff]  ;;  %v408_v3 = vld [vmem:[#allocation5 + $0x8] sm:$0xff]  ;;  %v409_v4 = vld [vmem:[#allocation5 + $0x10] sm:$0xff] }
  0xa0   : > { %5375 = vsyncadd (%p6837_p1), [#allocation9], 4294963200  ;;  %4473 = vmatprep.subr.bf16.mxu0 %v5403_v0  ;;  %3665 = vmatprep.mubr.msk.f32.mxu0 %vm5404_vm0, %v5405_v1  ;;  %v431_v5 = vand.u32 4294901760, %v407_v2  ;;  %v434_v6 = vand.u32 4294901760, %v408_v3  ;;  %v410_v7 = vld [vmem:[#allocation5 + $0x18] sm:$0xff]  ;;  %v437_v8 = vand.u32 4294901760, %v409_v4 }
  0xa1   : > { %4617 = vmatprep.subr.bf16.mxu1 %v5403_v0  ;;  %3875 = vmatprep.mubr.msk.f32.mxu1 %vm5404_vm0, %v5405_v1  ;;  %v440_v9 = vand.u32 4294901760, %v410_v7  ;;  %v411_v10 = vld [vmem:[#allocation5 + $0x20] sm:$0xff]  ;;  %v412_v11 = vld [vmem:[#allocation5 + $0x28] sm:$0xff]  ;;  %v413_v16 = vld [vmem:[#allocation5 + $0x30] sm:$0xff]  ;;  %s3222_s29 = sshll.u32 %s5478_s15, 7  ;;  %s405_s13 = scalar_lea.vmem [#allocation11], %s3211_s18 }
  0xa2   : > { %v5711_v12 = vpack.c.bf16 %v434_v6, %v431_v5  ;;  %v443_v14 = vand.u32 4294901760, %v411_v10  ;;  %v446_v15 = vand.u32 4294901760, %v412_v11  ;;  %v414_v17 = vld [vmem:[#allocation5 + $0x38] sm:$0xff]  ;;  %v449_v19 = vand.u32 4294901760, %v413_v16  ;;  %v415_v21 = vld [vmem:[#allocation5 + $0x40] sm:$0xff]  ;;  %v416_v22 = vld [vmem:[#allocation5 + $0x48] sm:$0xff] }
  0xa3   : > { %v5714_v13 = vpack.c.bf16 %v440_v9, %v437_v8  ;;  %v452_v20 = vand.u32 4294901760, %v414_v17  ;;  %v5722_v23 = vld [vmem:[%s5691_s21] sm:$0xff]  ;;  %v5724_v24 = vsub.f32 %v407_v2, %v431_v5  ;;  %v5726_v25 = vsub.f32 %v408_v3, %v434_v6  ;;  %v419_v32 = vld [vmem:[#allocation5 + $0x60] sm:$0xff]  ;;  %v420_v35 = vld [vmem:[#allocation5 + $0x68] sm:$0xff]  ;;  %s3093_s26 = sshll.u32 %s405_s13, 4  ;;  %s6862_s17 = sld [smem:[#allocation17_spill]]  ;;  %s6741_s26 = int_to_ptr.vmem [resolvable:$true] %s3093_s26 }
  0xa4   : > { %4475 = vmatpush3.bf16.msra.mxu0 %v5711_v12  ;;  %v5718_v18 = vpack.c.bf16 %v446_v15, %v443_v14  ;;  %v455_v27 = vand.u32 4294901760, %v415_v21  ;;  %v458_v28 = vand.u32 4294901760, %v416_v22  ;;  %v417_v29 = vld [vmem:[#allocation5 + $0x50] sm:$0xff]  ;;  %v418_v30 = vld [vmem:[#allocation5 + $0x58] sm:$0xff]  ;;  %v5733_v31 = vand.u32 4294901760, %v5722_v23  ;;  %s3080_s19 = scalar_lea.sflag [#allocation4], %s5685_s1 }
  0xa5   : > { %4476 = vmatprep.subr.bf16.mxu0 %v5403_v0  ;;  %v5729_v26 = vpack.c.bf16 %v452_v20, %v449_v19  ;;  %v5735_v33 = vsub.f32 %v409_v4, %v437_v8  ;;  %v461_v34 = vand.u32 4294901760, %v417_v29  ;;  %v421_v36 = vld [vmem:[#allocation5 + $0x70] sm:$0xff]  ;;  %v422_v37 = vld [vmem:[#allocation5 + $0x78] sm:$0xff]  ;;  %v464_v39 = vand.u32 4294901760, %v418_v30  ;;  %s5320_s22 = scalar_lea.vmem %s6741_s26, 128  ;;  %p6863_p5 = scmp.ne.s32.totalorder %s6830_s23, 0 }
  0xa6   : > { %v5738_v38 = vpack.c.bf16 %v458_v28, %v455_v27  ;;  %v524_v40 = vand.u32 4294901760, %v5724_v24  ;;  %v531_v41 = vand.u32 4294901760, %v5726_v25  ;;  %v5742_v42 = vsub.f32 %v410_v7, %v440_v9  ;;  %p5321_p6 = scmp.ne.s32.totalorder %s6741_s26, %s5320_s22  ;;  %s5406_s15 = smov [#allocation11]  }
  0xa7   : > { %v5744_v43 = vsub.f32 %v411_v10, %v443_v14  ;;  %v5746_v44 = vsub.f32 %v412_v11, %v446_v15  ;;  %v5751_v45 = vsub.f32 %v5722_v23, %v5733_v31  ;;  %v467_v46 = vand.u32 4294901760, %v419_v32  ;;  %s5324_s18 = sshll.u32 %s5406_s15, 4  ;;  %s5325_s18 = int_to_ptr.vmem [resolvable:$false] %s5324_s18 }
  0xa8   : > { %4478 = vmatpush3.bf16.msra.mxu0 %v5714_v13  ;;  %v470_v47 = vand.u32 4294901760, %v420_v35  ;;  %v473_v48 = vand.u32 4294901760, %v421_v36  ;;  %v476_v49 = vand.u32 4294901760, %v422_v37  ;;  %v5753_v50 = vsub.f32 %v413_v16, %v449_v19  ;;  %p5322_p7 = pnand %p5321_p6, %p6863_p5  ;;  %s5326_s24 = scalar_lea.vmem %s5325_s18, 256 }
  0xa9   : > { %4479 = vmatprep.subr.bf16.mxu0 %v5403_v0  ;;  %v5755_v51 = vsub.f32 %v414_v17, %v452_v20  ;;  %v5757_v52 = vsub.f32 %v415_v21, %v455_v27  ;;  %v538_v53 = vand.u32 4294901760, %v5735_v33  ;;  %v5761_v54 = vsub.f32 %v416_v22, %v458_v28  ;;  %s6739_s14 = scalar_lea.hbm %s6862_s17, %s3222_s29  ;;  %p5327_p12 = scmp.lt.s32.totalorder %s6741_s26, %s5325_s18 }
  0xaa   : > { %v5763_v55 = vpack.c.bf16 %v464_v39, %v461_v34  ;;  %v525_v56 = vsub.f32 %v5724_v24, %v524_v40  ;;  %v532_v57 = vsub.f32 %v5726_v25, %v531_v41  ;;  %v5768_v58 = vsub.f32 %v417_v29, %v461_v34  ;;  %p5323_p9 = pneg %p5322_p7  ;;  %p5328_p3 = scmp.lt.s32.totalorder %s5326_s24, %s5320_s22 }
  0xab   : > { %v5770_v59 = vsub.f32 %v418_v30, %v464_v39  ;;  %v5772_v60 = vsub.f32 %v419_v32, %v467_v46  ;;  %v6797_v61 = vand.u32 4294901760, %v5751_v45  ;;  %v5775_v62 = vpack.c.bf16 %v470_v47, %v467_v46 }
  0xac   : > { %4481 = vmatpush3.bf16.msra.mxu0 %v5718_v18  ;;  %v5777_v63 = vsub.f32 %v420_v35, %v470_v47  ;;  %v5779_v2 = vpack.c.bf16 %v476_v49, %v473_v48  ;;  %v5781_v3 = vsub.f32 %v421_v36, %v473_v48  ;;  %v5783_v4 = vsub.f32 %v422_v37, %v476_v49  ;;  %p5329_p13 = por %p5328_p3, %p5327_p12 }
  0xad   : > { %4482 = vmatprep.subr.bf16.mxu0 %v5403_v0  ;;  %v539_v5 = vsub.f32 %v5735_v33, %v538_v53  ;;  %v545_v6 = vand.u32 4294901760, %v5742_v42  ;;  %v552_v7 = vand.u32 4294901760, %v5744_v43  ;;  %v526_v8 = vand.u32 4294901760, %v525_v56 }
  0xae   : > { %v533_v9 = vand.u32 4294901760, %v532_v57  ;;  %v559_v10 = vand.u32 4294901760, %v5746_v44  ;;  %v566_v11 = vand.u32 4294901760, %v5753_v50  ;;  %v514_v14 = vsub.f32 %v5751_v45, %v6797_v61  ;;  %p5330_p0 = pnand %p5329_p13, %p5323_p9 }
  0xaf   : > { %v573_v15 = vand.u32 4294901760, %v5755_v51  ;;  %v580_v16 = vand.u32 4294901760, %v5757_v52  ;;  %v587_v17 = vand.u32 4294901760, %v5761_v54  ;;  %v594_v19 = vand.u32 4294901760, %v5768_v58 }
  0xb0   : > { %4484 = vmatpush3.bf16.msra.mxu0 %v5729_v26  ;;  %v601_v20 = vand.u32 4294901760, %v5770_v59  ;;  %v608_v21 = vand.u32 4294901760, %v5772_v60  ;;  %v615_v22 = vand.u32 4294901760, %v5777_v63  ;;  %v622_v27 = vand.u32 4294901760, %v5781_v3 }
  0xb1   : > { %4485 = vmatprep.subr.bf16.mxu0 %v5403_v0  ;;  %v629_v28 = vand.u32 4294901760, %v5783_v4  ;;  %v5804_v29 = vpack.c.bf16 %v531_v41, %v524_v40  ;;  %v5806_v30 = vpack.c.bf16 %v545_v6, %v538_v53  ;;  %v546_v32 = vsub.f32 %v5742_v42, %v545_v6 }
  0xb2   : > { %v5810_v34 = vpack.c.bf16 %v559_v10, %v552_v7  ;;  %v5812_v35 = vpack.c.bf16 %v573_v15, %v566_v11  ;;  %v5814_v36 = vpack.c.bf16 %v587_v17, %v580_v16  ;;  %v5817_v37 = vpack.c.bf16 %v601_v20, %v594_v19 }
  0xb3   : > { %v5819_v39 = vpack.c.bf16 %v615_v22, %v608_v21  ;;  %v5821_v40 = vpack.c.bf16 %v629_v28, %v622_v27  ;;  %v515_v41 = vand.u32 4294901760, %v514_v14  ;;  %v540_v46 = vand.u32 4294901760, %v539_v5 }
  0xb4   : > { %4487 = vmatpush3.bf16.msra.mxu0 %v5738_v38  ;;  %v4498_v47 = vpack.c.bf16 %v533_v9, %v526_v8  ;;  %v547_v48 = vand.u32 4294901760, %v546_v32  ;;  %v553_v49 = vsub.f32 %v5744_v43, %v552_v7  ;;  %v560_v53 = vsub.f32 %v5746_v44, %v559_v10 }
  0xb5   : > { %4488 = vmatprep.subr.bf16.mxu0 %v5403_v0  ;;  %v567_v56 = vsub.f32 %v5753_v50, %v566_v11  ;;  %v574_v14 = vsub.f32 %v5755_v51, %v573_v15  ;;  %v581_v5 = vsub.f32 %v5757_v52, %v580_v16  ;;  %v588_v10 = vsub.f32 %v5761_v54, %v587_v17 }
  0xb6   : > { %v4501_v57 = vpack.c.bf16 %v547_v48, %v540_v46  ;;  %v554_v6 = vand.u32 4294901760, %v553_v49  ;;  %v561_v61 = vand.u32 4294901760, %v560_v53  ;;  %v595_v15 = vsub.f32 %v5768_v58, %v594_v19 }
  0xb7   : > { %v568_v8 = vand.u32 4294901760, %v567_v56  ;;  %v575_v9 = vand.u32 4294901760, %v574_v14  ;;  %v582_v11 = vand.u32 4294901760, %v581_v5  ;;  %v602_v46 = vsub.f32 %v5770_v59, %v601_v20  ;;  %v1074_v5 = vld [vmem:[#allocation7 + $0x10] sm:$0xff] }
  0xb8   : > { %4490 = vmatpush3.bf16.msra.mxu0 %v5763_v55  ;;  %v4504_v7 = vpack.c.bf16 %v561_v61, %v554_v6  ;;  %v609_v16 = vsub.f32 %v5772_v60, %v608_v21  ;;  %v616_v17 = vsub.f32 %v5777_v63, %v615_v22  ;;  %v623_v19 = vsub.f32 %v5781_v3, %v622_v27  ;;  %v1072_v27 = vld [vmem:[#allocation7] sm:$0xff] }
  0xb9   : > { %4491 = vmatprep.subr.bf16.mxu0 %v5403_v0  ;;  %v4507_v32 = vpack.c.bf16 %v575_v9, %v568_v8  ;;  %v603_v48 = vand.u32 4294901760, %v602_v46  ;;  %v630_v20 = vsub.f32 %v5783_v4, %v629_v28  ;;  %v4522_v14 = vpack.c.bf16 %v5726_v25, %v5724_v24  ;;  %v1073_v28 = vld [vmem:[#allocation7 + $0x8] sm:$0xff]  ;;  %v1078_v46 = vld [vmem:[#allocation7 + $0x30] sm:$0xff] }
  0xba   : > { %v610_v49 = vand.u32 4294901760, %v609_v16  ;;  %v617_v56 = vand.u32 4294901760, %v616_v17  ;;  %v1096_v8 = vand.u32 4294901760, %v1072_v27  ;;  %v1099_v9 = vand.u32 4294901760, %v1073_v28  ;;  %v1077_v24 = vld [vmem:[#allocation7 + $0x28] sm:$0xff]  ;;  %v1079_v16 = vld [vmem:[#allocation7 + $0x38] sm:$0xff] }
  0xbb   : > { %v631_v6 = vand.u32 4294901760, %v630_v20  ;;  %v1081_v17 = vld [vmem:[#allocation7 + $0x48] sm:$0xff] }
  0xbc   : > { %4493 = vmatpush3.bf16.msra.mxu0 %v5775_v62  ;;  %v4516_v21 = vpack.c.bf16 %v617_v56, %v610_v49  ;;  %v4528_v49 = vpack.c.bf16 %v5746_v44, %v5744_v43 }
  0xbd   : > { %4494 = vmatprep.subr.bf16.mxu0 %v5403_v0 }
  0xc0   : > { %4496 = vmatpush3.bf16.msra.mxu0 %v5779_v2 }
  0xc1   : > { %4497 = vmatprep.subr.bf16.mxu0 %v5403_v0 }
  0xc3   : > { %3666 = vmatmul.mubr.f32.vlgmr.msra.gmra.mrb[0].mxu0 %v515_v41  ;;  %v589_v41 = vand.u32 4294901760, %v588_v10  ;;  %v1075_v10 = vld [vmem:[#allocation7 + $0x18] sm:$0xff] }
  0xc4   : > { %4499 = vmatpush3.bf16.msra.mxu0 %v4498_v47  ;;  %3700 = vmatprep.mubr.msk.f32.mxu0 %vm5404_vm0, %v5405_v1  ;;  %v596_v47 = vand.u32 4294901760, %v595_v15  ;;  %v1105_v25 = vand.u32 4294901760, %v1075_v10  ;;  %v1111_v15 = vand.u32 4294901760, %v1077_v24 }
  0xc5   : > { %4500 = vmatprep.subr.bf16.mxu0 %v5403_v0  ;;  %v4510_v61 = vpack.c.bf16 %v589_v41, %v582_v11  ;;  %v1102_v11 = vand.u32 4294901760, %v1074_v5 }
  0xc6   : > { %v4513_v53 = vpack.c.bf16 %v603_v48, %v596_v47  ;;  %v5855_v47 = vpack.c.bf16 %v1099_v9, %v1096_v8  ;;  %v5867_v56 = vsub.f32 %v1075_v10, %v1105_v25  ;;  %v5872_v20 = vsub.f32 %v1077_v24, %v1111_v15 }
  0xc7   : > { %v5861_v48 = vsub.f32 %v1074_v5, %v1102_v11 }
  0xc8   : > { %4502 = vmatpush3.bf16.msra.mxu0 %v4501_v57  ;;  %v624_v57 = vand.u32 4294901760, %v623_v19  ;;  %4619 = vmatpush3.bf16.msra.mxu1 %v5855_v47  ;;  %v1210_v24 = vand.u32 4294901760, %v5867_v56 }
  0xc9   : > { %4503 = vmatprep.subr.bf16.mxu0 %v5403_v0  ;;  %4620 = vmatprep.subr.bf16.mxu1 %v5403_v0 }
  0xca   : > { %v4519_v22 = vpack.c.bf16 %v631_v6, %v624_v57  ;;  %v1117_v57 = vand.u32 4294901760, %v1079_v16 }
  0xcc   : > { %4505 = vmatpush3.bf16.msra.mxu0 %v4504_v7  ;;  %v4525_v7 = vpack.c.bf16 %v5742_v42, %v5735_v33  ;;  %v5857_v33 = vsub.f32 %v1072_v27, %v1096_v8  ;;  %v5859_v42 = vsub.f32 %v1073_v28, %v1099_v9  ;;  %v5878_v44 = vsub.f32 %v1079_v16, %v1117_v57 }
  0xcd   : > { %4506 = vmatprep.subr.bf16.mxu0 %v5403_v0  ;;  %v4531_v28 = vpack.c.bf16 %v5755_v51, %v5753_v50  ;;  %v4537_v50 = vpack.c.bf16 %v5770_v59, %v5768_v58  ;;  %v6838_v58 = vand.u32 4294901760, %v5751_v45 }
  0xd0   : > { %4508 = vmatpush3.bf16.msra.mxu0 %v4507_v32  ;;  %v1076_v32 = vld [vmem:[#allocation7 + $0x20] sm:$0xff] }
  0xd1   : > { %4509 = vmatprep.subr.bf16.mxu0 %v5403_v0  ;;  %v1108_v41 = vand.u32 4294901760, %v1076_v32 }
  0xd3   : > { %v5869_v19 = vsub.f32 %v1076_v32, %v1108_v41  ;;  %v5887_v5 = vpack.c.bf16 %v1111_v15, %v1108_v41  ;;  %v1203_v32 = vand.u32 4294901760, %v5861_v48  ;;  %v1211_v15 = vsub.f32 %v5867_v56, %v1210_v24 }
  0xd4   : > { %4511 = vmatpush3.bf16.msra.mxu0 %v4510_v61  ;;  %v1080_v61 = vld [vmem:[#allocation7 + $0x40] sm:$0xff] }
  0xd5   : > { %4512 = vmatprep.subr.bf16.mxu0 %v5403_v0  ;;  %v1120_v6 = vand.u32 4294901760, %v1080_v61  ;;  %v1204_v41 = vsub.f32 %v5861_v48, %v1203_v32 }
  0xd7   : > { %v1205_v16 = vand.u32 4294901760, %v1204_v41 }
  0xd8   : > { %4514 = vmatpush3.bf16.msra.mxu0 %v4513_v53  ;;  %v5865_v53 = vpack.c.bf16 %v1105_v25, %v1102_v11 }
  0xd9   : > { %4515 = vmatprep.subr.bf16.mxu0 %v5403_v0 }
  0xda   : > { %4622 = vmatpush3.bf16.msra.mxu1 %v5865_v53 }
  0xdb   : > { %4623 = vmatprep.subr.bf16.mxu1 %v5403_v0 }
  0xdc   : > { %4517 = vmatpush3.bf16.msra.mxu0 %v4516_v21  ;;  %v1114_v21 = vand.u32 4294901760, %v1078_v46 }
  0xdd   : > { %4518 = vmatprep.subr.bf16.mxu0 %v5403_v0 }
  0xde   : > { %v5876_v43 = vsub.f32 %v1078_v46, %v1114_v21  ;;  %4625 = vmatpush3.bf16.msra.mxu1 %v5887_v5  ;;  %v5894_v8 = vpack.c.bf16 %v1117_v57, %v1114_v21 }
  0xdf   : > { %4626 = vmatprep.subr.bf16.mxu1 %v5403_v0 }
  0xe0   : > { %4520 = vmatpush3.bf16.msra.mxu0 %v4519_v22  ;;  %v1123_v22 = vand.u32 4294901760, %v1081_v17 }
  0xe1   : > { %4521 = vmatprep.subr.bf16.mxu0 %v5403_v0 }
  0xe2   : > { %v5882_v27 = vsub.f32 %v1081_v17, %v1123_v22  ;;  %4628 = vmatpush3.bf16.msra.mxu1 %v5894_v8  ;;  %v5901_v51 = vpack.c.bf16 %v1123_v22, %v1120_v6  ;;  %v1217_v17 = vand.u32 4294901760, %v5869_v19 }
  0xe3   : > { %3701 = vmatmul.mubr.f32.vlgmr.msra.gmra.mrb[0].mxu0 %v5733_v31  ;;  %4629 = vmatprep.subr.bf16.mxu1 %v5403_v0 }
  0xe4   : > { %4523 = vmatpush3.bf16.msra.mxu0 %v4522_v14  ;;  %3735 = vmatprep.mubr.msk.f32.mxu0 %vm5404_vm0, %v5405_v1  ;;  %v5880_v14 = vsub.f32 %v1080_v61, %v1120_v6  ;;  %v1212_v61 = vand.u32 4294901760, %v1211_v15  ;;  %v1218_v57 = vsub.f32 %v5869_v19, %v1217_v17 }
  0xe5   : > { %4524 = vmatprep.subr.bf16.mxu0 %v5403_v0 }
  0xe6   : > { %4631 = vmatpush3.bf16.msra.mxu1 %v5901_v51  ;;  %v4645_v21 = vpack.c.bf16 %v1212_v61, %v1205_v16  ;;  %v1219_v22 = vand.u32 4294901760, %v1218_v57 }
  0xe7   : > { %4632 = vmatprep.subr.bf16.mxu1 %v5403_v0 }
  0xe8   : > { %4526 = vmatpush3.bf16.msra.mxu0 %v4525_v7  ;;  %v4534_v7 = vpack.c.bf16 %v5761_v54, %v5757_v52  ;;  %v4540_v52 = vpack.c.bf16 %v5777_v63, %v5772_v60  ;;  %v4543_v54 = vpack.c.bf16 %v5783_v4, %v5781_v3  ;;  %v1087_v63 = vld [vmem:[#allocation7 + $0x78] sm:$0xff] }
  0xe9   : > { %4527 = vmatprep.subr.bf16.mxu0 %v5403_v0 }
  0xec   : > { %4529 = vmatpush3.bf16.msra.mxu0 %v4528_v49  ;;  %v1224_v49 = vand.u32 4294901760, %v5872_v20 }
  0xed   : > { %4530 = vmatprep.subr.bf16.mxu0 %v5403_v0 }
  0xee   : > { %v1225_v6 = vsub.f32 %v5872_v20, %v1224_v49 }
  0xf0   : > { %4532 = vmatpush3.bf16.msra.mxu0 %v4531_v28  ;;  %v1226_v28 = vand.u32 4294901760, %v1225_v6 }
  0xf1   : > { %4533 = vmatprep.subr.bf16.mxu0 %v5403_v0 }
  0xf4   : > { %4535 = vmatpush3.bf16.msra.mxu0 %v4534_v7  ;;  %v1231_v7 = vand.u32 4294901760, %v5876_v43 }
  0xf5   : > { %4536 = vmatprep.subr.bf16.mxu0 %v5403_v0 }
  0xf8   : > { %4538 = vmatpush3.bf16.msra.mxu0 %v4537_v50  ;;  %v1238_v50 = vand.u32 4294901760, %v5878_v44 }
  0xf9   : > { %4539 = vmatprep.subr.bf16.mxu0 %v5403_v0 }
  0xfc   : > { %4541 = vmatpush3.bf16.msra.mxu0 %v4540_v52  ;;  %v4648_v52 = vpack.c.bf16 %v1226_v28, %v1219_v22 }
  0xfd   : > { %4542 = vmatprep.subr.bf16.mxu0 %v5403_v0 }
 0x100   : > { %4544 = vmatpush3.bf16.msra.mxu0 %v4543_v54  ;;  %v1232_v54 = vsub.f32 %v5876_v43, %v1231_v7 }
 0x101   : > { %4545 = vmatprep.subr.bf16.mxu0 %v5403_v0 }
 0x103   : > { %3736 = vmatmul.mubr.f32.vlgmr.msra.gmra.mrb[0].mxu0 %v5751_v45  ;;  %v1084_v45 = vld [vmem:[#allocation7 + $0x60] sm:$0xff] }
 0x104   : > { %4547 = vmatpush3.bf16.msra.mxu0 %v5711_v12  ;;  %3770 = vmatprep.mubr.msk.f32.mxu0 %vm5404_vm0, %v5405_v1  ;;  %v1132_v59 = vand.u32 4294901760, %v1084_v45 }
 0x105   : > { %4548 = vmatprep.subr.bf16.mxu0 %v5403_v0 }
 0x106   : > { %v5986_v4 = vsub.f32 %v1084_v45, %v1132_v59 }
 0x108   : > { %4550 = vmatpush3.bf16.msra.mxu0 %v5714_v13  ;;  %v6801_v41 = vand.u32 4294901760, %v5986_v4 }
 0x109   : > { %4551 = vmatprep.subr.bf16.mxu0 %v5403_v0 }
 0x10a   : > { %v1274_v61 = vsub.f32 %v5986_v4, %v6801_v41 }
 0x10c   : > { %4553 = vmatpush3.bf16.msra.mxu0 %v5718_v18  ;;  %v1275_v6 = vand.u32 4294901760, %v1274_v61 }
 0x10d   : > { %4554 = vmatprep.subr.bf16.mxu0 %v5403_v0 }
 0x110   : > { %4556 = vmatpush3.bf16.msra.mxu0 %v5729_v26 }
 0x111   : > { %4557 = vmatprep.subr.bf16.mxu0 %v5403_v0 }
 0x114   : > { %4559 = vmatpush3.bf16.msra.mxu0 %v5738_v38 }
 0x115   : > { %4560 = vmatprep.subr.bf16.mxu0 %v5403_v0 }
 0x118   : > { %4562 = vmatpush3.bf16.msra.mxu0 %v5763_v55 }
 0x119   : > { %4563 = vmatprep.subr.bf16.mxu0 %v5403_v0 }
 0x11c   : > { %4565 = vmatpush3.bf16.msra.mxu0 %v5775_v62 }
 0x11d   : > { %4566 = vmatprep.subr.bf16.mxu0 %v5403_v0 }
 0x120   : > { %4568 = vmatpush3.bf16.msra.mxu0 %v5779_v2 }
 0x121   : > { %4569 = vmatprep.subr.bf16.mxu0 %v5403_v0 }
 0x123   : > { %3771 = vmatmul.mubr.f32.vlgmr.msra.gmra.mrb[0].mxu0 %v6838_v58  ;;  %v1239_v58 = vsub.f32 %v5878_v44, %v1238_v50 }
 0x124   : > { %4571 = vmatpush3.bf16.msra.mxu0 %v5804_v29  ;;  %3805 = vmatprep.mubr.msk.f32.mxu0 %vm5404_vm0, %v5405_v1 }
 0x125   : > { %4572 = vmatprep.subr.bf16.mxu0 %v5403_v0 }
 0x128   : > { %4574 = vmatpush3.bf16.msra.mxu0 %v5806_v30 }
 0x129   : > { %4575 = vmatprep.subr.bf16.mxu0 %v5403_v0 }
 0x12c   : > { %4577 = vmatpush3.bf16.msra.mxu0 %v5810_v34  ;;  %v1141_v34 = vand.u32 4294901760, %v1087_v63 }
 0x12d   : > { %4578 = vmatprep.subr.bf16.mxu0 %v5403_v0 }
 0x130   : > { %4580 = vmatpush3.bf16.msra.mxu0 %v5812_v35  ;;  %v1189_v35 = vand.u32 4294901760, %v5857_v33 }
 0x131   : > { %4581 = vmatprep.subr.bf16.mxu0 %v5403_v0 }
 0x132   : > { %v1190_v9 = vsub.f32 %v5857_v33, %v1189_v35 }
 0x134   : > { %4583 = vmatpush3.bf16.msra.mxu0 %v5814_v36  ;;  %v1196_v36 = vand.u32 4294901760, %v5859_v42  ;;  %v1191_v11 = vand.u32 4294901760, %v1190_v9 }
 0x135   : > { %4584 = vmatprep.subr.bf16.mxu0 %v5403_v0 }
 0x136   : > { %v1197_v10 = vsub.f32 %v5859_v42, %v1196_v36 }
 0x138   : > { %4586 = vmatpush3.bf16.msra.mxu0 %v5817_v37  ;;  %v1198_v25 = vand.u32 4294901760, %v1197_v10 }
 0x139   : > { %4587 = vmatprep.subr.bf16.mxu0 %v5403_v0 }
 0x13a   : > { %v6015_v46 = vpack.c.bf16 %v1198_v25, %v1191_v11 }
 0x13c   : > { %4589 = vmatpush3.bf16.msra.mxu0 %v5819_v39 }
 0x13d   : > { %4590 = vmatprep.subr.bf16.mxu0 %v5403_v0 }
 0x140   : > { %4592 = vmatpush3.bf16.msra.mxu0 %v5821_v40  ;;  %v5997_v40 = vsub.f32 %v1087_v63, %v1141_v34 }
 0x141   : > { %4593 = vmatprep.subr.bf16.mxu0 %v5403_v0 }
 0x143   : > { %3806 = vmatmul.mubr.f32.vlgmr.msra.gmra.mrb[0].mxu0 %v5733_v31 }
 0x144   : > { %4595 = vmatpush3.bf16.msra.mxu0 %v5711_v12  ;;  %3840 = vmatprep.mubr.msk.f32.mxu0 %vm5404_vm0, %v5405_v1  ;;  %v1082_v12 = vld [vmem:[#allocation7 + $0x50] sm:$0xff] }
 0x145   : > { %4596 = vmatprep.subr.bf16.mxu0 %v5403_v0 }
 0x148   : > { %4598 = vmatpush3.bf16.msra.mxu0 %v5714_v13  ;;  %v1083_v13 = vld [vmem:[#allocation7 + $0x58] sm:$0xff] }
 0x149   : > { %4599 = vmatprep.subr.bf16.mxu0 %v5403_v0 }
 0x14c   : > { %4601 = vmatpush3.bf16.msra.mxu0 %v5718_v18  ;;  %v1126_v18 = vand.u32 4294901760, %v1082_v12 }
 0x14d   : > { %4602 = vmatprep.subr.bf16.mxu0 %v5403_v0 }
 0x150   : > { %4604 = vmatpush3.bf16.msra.mxu0 %v5729_v26  ;;  %v1129_v26 = vand.u32 4294901760, %v1083_v13 }
 0x151   : > { %4605 = vmatprep.subr.bf16.mxu0 %v5403_v0 }
 0x152   : > { %v5983_v3 = vsub.f32 %v1083_v13, %v1129_v26  ;;  %v1240_v13 = vand.u32 4294901760, %v1239_v58 }
 0x154   : > { %4607 = vmatpush3.bf16.msra.mxu0 %v5738_v38  ;;  %v5975_v38 = vpack.c.bf16 %v1129_v26, %v1126_v18  ;;  %v1252_v26 = vand.u32 4294901760, %v5882_v27 }
 0x155   : > { %4608 = vmatprep.subr.bf16.mxu0 %v5403_v0 }
 0x156   : > { %4634 = vmatpush3.bf16.msra.mxu1 %v5975_v38 }
 0x157   : > { %4635 = vmatprep.subr.bf16.mxu1 %v5403_v0 }
 0x158   : > { %4610 = vmatpush3.bf16.msra.mxu0 %v5763_v55  ;;  %v1085_v55 = vld [vmem:[#allocation7 + $0x68] sm:$0xff] }
 0x159   : > { %4611 = vmatprep.subr.bf16.mxu0 %v5403_v0  ;;  %v1135_v60 = vand.u32 4294901760, %v1085_v55 }
 0x15b   : > { %v5988_v29 = vsub.f32 %v1085_v55, %v1135_v60 }
 0x15c   : > { %4613 = vmatpush3.bf16.msra.mxu0 %v5775_v62  ;;  %v5979_v62 = vpack.c.bf16 %v1135_v60, %v1132_v59  ;;  %v1253_v59 = vsub.f32 %v5882_v27, %v1252_v26 }
 0x15d   : > { %4614 = vmatprep.subr.bf16.mxu0 %v5403_v0  ;;  %v6800_v15 = vand.u32 4294901760, %v5988_v29 }
 0x15e   : > { %4637 = vmatpush3.bf16.msra.mxu1 %v5979_v62 }
 0x15f   : > { %4638 = vmatprep.subr.bf16.mxu1 %v5403_v0  ;;  %v1281_v57 = vsub.f32 %v5988_v29, %v6800_v15 }
 0x160   : > { %4616 = vmatpush3.bf16.msra.mxu0 %v5779_v2  ;;  %v5981_v2 = vsub.f32 %v1082_v12, %v1126_v18  ;;  %v1233_v12 = vand.u32 4294901760, %v1232_v54  ;;  %v1245_v18 = vand.u32 4294901760, %v5880_v14  ;;  %v6798_v54 = vand.u32 4294901760, %v5997_v40 }
 0x161   : > { %4761 = vmatprep.subr.bf16.mxu0 %v5403_v0  ;;  %v1282_v22 = vand.u32 4294901760, %v1281_v57  ;;  %v4684_v57 = vpack.c.bf16 %v5988_v29, %v5986_v4 }
 0x162   : > { %v4651_v45 = vpack.c.bf16 %v1240_v13, %v1233_v12  ;;  %v1246_v55 = vsub.f32 %v5880_v14, %v1245_v18  ;;  %v1259_v63 = vand.u32 4294901760, %v5981_v2  ;;  %v1295_v13 = vsub.f32 %v5997_v40, %v6798_v54 }
 0x163   : > { %3841 = vmatmul.mubr.f32.vlgmr.msra.gmra.mrb[0].mxu0 %v5733_v31  ;;  %v1086_v31 = vld [vmem:[#allocation7 + $0x70] sm:$0xff]  ;;  %v4660_v58 = vpack.c.bf16 %v1282_v22, %v1275_v6  ;;  %v4681_v61 = vpack.c.bf16 %v5983_v3, %v5981_v2 }
 0x164   : > { %4085 = vmatprep.mubr.msk.f32.mxu0 %vm5404_vm0, %v5405_v1  ;;  %v1138_v30 = vand.u32 4294901760, %v1086_v31  ;;  %v1247_v60 = vand.u32 4294901760, %v1246_v55  ;;  %v1260_v9 = vsub.f32 %v5981_v2, %v1259_v63  ;;  %v3217_v22 = vld [vmem:[%s6785_s2] ss:$0 sm:$0xff]  ;;  %v1743_v2 = vld [vmem:[#allocation8] sm:$0xff] }
 0x166   : > { %v5993_v37 = vpack.c.bf16 %v1141_v34, %v1138_v30  ;;  %v5995_v39 = vsub.f32 %v1086_v31, %v1138_v30  ;;  %v1254_v31 = vand.u32 4294901760, %v1253_v59  ;;  %v6802_v30 = vand.u32 4294901760, %v5983_v3 }
 0x167   : > { %v1261_v11 = vand.u32 4294901760, %v1260_v9  ;;  %v1296_v59 = vand.u32 4294901760, %v1295_v13  ;;  %v4669_v9 = vpack.c.bf16 %v5867_v56, %v5861_v48  ;;  %v4726_v48 = vpack.c.bf16 %v1252_v26, %v1245_v18 }
 0x168   : > { %4640 = vmatpush3.bf16.msra.mxu1 %v5993_v37  ;;  %v4654_v34 = vpack.c.bf16 %v1254_v31, %v1247_v60  ;;  %v1267_v10 = vsub.f32 %v5983_v3, %v6802_v30  ;;  %v6799_v28 = vand.u32 4294901760, %v5995_v39  ;;  %v4666_v31 = vpack.c.bf16 %v5859_v42, %v5857_v33 }
 0x169   : > { %4641 = vmatprep.subr.bf16.mxu1 %v5403_v0  ;;  %v4687_v6 = vpack.c.bf16 %v5997_v40, %v5995_v39  ;;  %v4720_v33 = vpack.c.bf16 %v1224_v49, %v1217_v17  ;;  %v4723_v42 = vpack.c.bf16 %v1238_v50, %v1231_v7  ;;  %v6839_v56 = vand.u32 4294901760, %v5983_v3  ;;  %v1744_v3 = vld [vmem:[#allocation8 + $0x8] sm:$0xff] }
 0x16a   : > { %v1268_v25 = vand.u32 4294901760, %v1267_v10  ;;  %v1288_v12 = vsub.f32 %v5995_v39, %v6799_v28  ;;  %v4672_v10 = vpack.c.bf16 %v5872_v20, %v5869_v19  ;;  %v6840_v20 = vand.u32 4294901760, %v5986_v4  ;;  %v1745_v4 = vld [vmem:[#allocation8 + $0x10] sm:$0xff] }
 0x16b   : > { %v4729_v19 = vpack.c.bf16 %v6839_v56, %v1259_v63 }
 0x16c   : > { %v4657_v16 = vpack.c.bf16 %v1268_v25, %v1261_v11  ;;  %v1289_v55 = vand.u32 4294901760, %v1288_v12  ;;  %v4675_v11 = vpack.c.bf16 %v5878_v44, %v5876_v43  ;;  %v4678_v25 = vpack.c.bf16 %v5882_v27, %v5880_v14 }
 0x16d   : > { %v6841_v43 = vand.u32 4294901760, %v5988_v29  ;;  %v6842_v14 = vand.u32 4294901760, %v5995_v39  ;;  %v6843_v27 = vand.u32 4294901760, %v5997_v40  ;;  %v1767_v29 = vand.u32 4294901760, %v1743_v2 }
 0x16e   : > { %v4663_v60 = vpack.c.bf16 %v1296_v59, %v1289_v55  ;;  %v1773_v39 = vand.u32 4294901760, %v1745_v4 }
 0x16f   : > { %v4732_v44 = vpack.c.bf16 %v6841_v43, %v6840_v20  ;;  %v1756_v20 = vld [vmem:[#allocation8 + $0x68] sm:$0xff] }
 0x170   : > { %v6200_v49 = vsub.f32 %v1745_v4, %v1773_v39 }
 0x236   : > { %v1067_v12 = vpop.f32.mrb[0].mxu0 }
 0x237   : > { %v5049_v13 = vadd.f32 %v3217_v22, %v1067_v12  ;;  %v3842_v55 = vpop.f32.mrb[1].mxu0  ;;  %v1751_v12 = vld [vmem:[#allocation8 + $0x40] sm:$0xff] }
 0x238   : > { %v1791_v55 = vand.u32 4294901760, %v1751_v12 }
 0x239   : > { %v1071_v59 = vmax.f32 %v5049_v13, 0.0  ;;  %v1752_v13 = vld [vmem:[#allocation8 + $0x48] sm:$0xff] }
 0x23b   : > { %v6084_v54 = vand.u32 4294901760, %v1071_v59 }
 0x23d   : > { %v1177_v28 = vsub.f32 %v1071_v59, %v6084_v54  ;;  %v1794_v59 = vand.u32 4294901760, %v1752_v13 }
 0x23f   : > { %v1178_v15 = vand.u32 4294901760, %v1177_v28 }
 0x241   : > { %v1179_v41 = vsub.f32 %v1177_v28, %v1178_v15 }
 0x243   : > { %v1180_v30 = vand.u32 4294901760, %v1179_v41 }
 0x245   : > { %3876 = vmatmul.mubr.f32.vlgmr.msra.gmra.mrb[0].mxu1 %v1180_v30 }
 0x246   : > { %4643 = vmatpush3.bf16.msra.mxu1 %v6015_v46  ;;  %3910 = vmatprep.mubr.msk.f32.mxu1 %vm5404_vm0, %v5405_v1  ;;  %v4714_v46 = vpack.c.bf16 %v1196_v36, %v1189_v35  ;;  %v4735_v35 = vpack.c.bf16 %v6843_v27, %v6842_v14  ;;  %v1770_v36 = vand.u32 4294901760, %v1744_v3 }
 0x247   : > { %4644 = vmatprep.subr.bf16.mxu1 %v5403_v0 }
 0x248   : > { %v6198_v17 = vsub.f32 %v1744_v3, %v1770_v36 }
 0x24a   : > { %4646 = vmatpush3.bf16.msra.mxu1 %v4645_v21  ;;  %v4717_v21 = vpack.c.bf16 %v1210_v24, %v1203_v32  ;;  %v6194_v32 = vpack.c.bf16 %v1770_v36, %v1767_v29  ;;  %v6196_v24 = vsub.f32 %v1743_v2, %v1767_v29 }
 0x24b   : > { %4647 = vmatprep.subr.bf16.mxu1 %v5403_v0 }
 0x24c   : > { %4763 = vmatpush3.bf16.msra.mxu0 %v6194_v32 }
 0x24d   : > { %4764 = vmatprep.subr.bf16.mxu0 %v5403_v0 }
 0x24e   : > { %4649 = vmatpush3.bf16.msra.mxu1 %v4648_v52 }
 0x24f   : > { %4650 = vmatprep.subr.bf16.mxu1 %v5403_v0 }
 0x252   : > { %4652 = vmatpush3.bf16.msra.mxu1 %v4651_v45 }
 0x253   : > { %4653 = vmatprep.subr.bf16.mxu1 %v5403_v0 }
 0x256   : > { %4655 = vmatpush3.bf16.msra.mxu1 %v4654_v34 }
 0x257   : > { %4656 = vmatprep.subr.bf16.mxu1 %v5403_v0 }
 0x25a   : > { %4658 = vmatpush3.bf16.msra.mxu1 %v4657_v16 }
 0x25b   : > { %4659 = vmatprep.subr.bf16.mxu1 %v5403_v0 }
 0x25e   : > { %4661 = vmatpush3.bf16.msra.mxu1 %v4660_v58 }
 0x25f   : > { %4662 = vmatprep.subr.bf16.mxu1 %v5403_v0 }
 0x262   : > { %4664 = vmatpush3.bf16.msra.mxu1 %v4663_v60 }
 0x263   : > { %4665 = vmatprep.subr.bf16.mxu1 %v5403_v0 }
 0x265   : > { %3911 = vmatmul.mubr.f32.vlgmr.msra.gmra.mrb[2].mxu1 %v6084_v54 }
 0x266   : > { %4667 = vmatpush3.bf16.msra.mxu1 %v4666_v31  ;;  %3945 = vmatprep.mubr.msk.f32.mxu1 %vm5404_vm0, %v5405_v1  ;;  %v1747_v31 = vld [vmem:[#allocation8 + $0x20] sm:$0xff] }
 0x267   : > { %4668 = vmatprep.subr.bf16.mxu1 %v5403_v0 }
 0x26a   : > { %4670 = vmatpush3.bf16.msra.mxu1 %v4669_v9  ;;  %v1748_v9 = vld [vmem:[#allocation8 + $0x28] sm:$0xff] }
 0x26b   : > { %4671 = vmatprep.subr.bf16.mxu1 %v5403_v0 }
 0x26e   : > { %4673 = vmatpush3.bf16.msra.mxu1 %v4672_v10  ;;  %v1779_v10 = vand.u32 4294901760, %v1747_v31 }
 0x26f   : > { %4674 = vmatprep.subr.bf16.mxu1 %v5403_v0 }
 0x270   : > { %v6231_v14 = vsub.f32 %v1747_v31, %v1779_v10 }
 0x272   : > { %4676 = vmatpush3.bf16.msra.mxu1 %v4675_v11  ;;  %v1782_v11 = vand.u32 4294901760, %v1748_v9  ;;  %v6814_v31 = vand.u32 4294901760, %v6231_v14 }
 0x273   : > { %4677 = vmatprep.subr.bf16.mxu1 %v5403_v0 }
 0x274   : > { %v6233_v27 = vsub.f32 %v1748_v9, %v1782_v11 }
 0x276   : > { %4679 = vmatpush3.bf16.msra.mxu1 %v4678_v25  ;;  %v6215_v25 = vpack.c.bf16 %v1782_v11, %v1779_v10  ;;  %v6813_v9 = vand.u32 4294901760, %v6233_v27  ;;  %v1889_v11 = vsub.f32 %v6231_v14, %v6814_v31 }
 0x277   : > { %4680 = vmatprep.subr.bf16.mxu1 %v5403_v0 }
 0x27a   : > { %4682 = vmatpush3.bf16.msra.mxu1 %v4681_v61  ;;  %v1749_v61 = vld [vmem:[#allocation8 + $0x30] sm:$0xff] }
 0x27b   : > { %4683 = vmatprep.subr.bf16.mxu1 %v5403_v0 }
 0x27e   : > { %4685 = vmatpush3.bf16.msra.mxu1 %v4684_v57  ;;  %v1750_v57 = vld [vmem:[#allocation8 + $0x38] sm:$0xff] }
 0x27f   : > { %4686 = vmatprep.subr.bf16.mxu1 %v5403_v0  ;;  %v1788_v22 = vand.u32 4294901760, %v1750_v57 }
 0x282   : > { %4688 = vmatpush3.bf16.msra.mxu1 %v4687_v6  ;;  %v1785_v6 = vand.u32 4294901760, %v1749_v61 }
 0x283   : > { %4689 = vmatprep.subr.bf16.mxu1 %v5403_v0 }
 0x285   : > { %3946 = vmatmul.mubr.f32.vlgmr.msra.gmra.mrb[4].mxu1 %v1177_v28 }
 0x286   : > { %4691 = vmatpush3.bf16.msra.mxu1 %v5855_v47  ;;  %3980 = vmatprep.mubr.msk.f32.mxu1 %vm5404_vm0, %v5405_v1 }
 0x287   : > { %4692 = vmatprep.subr.bf16.mxu1 %v5403_v0 }
 0x28a   : > { %4694 = vmatpush3.bf16.msra.mxu1 %v5865_v53 }
 0x28b   : > { %4695 = vmatprep.subr.bf16.mxu1 %v5403_v0 }
 0x28e   : > { %4697 = vmatpush3.bf16.msra.mxu1 %v5887_v5 }
 0x28f   : > { %4698 = vmatprep.subr.bf16.mxu1 %v5403_v0 }
 0x292   : > { %4700 = vmatpush3.bf16.msra.mxu1 %v5894_v8 }
 0x293   : > { %4701 = vmatprep.subr.bf16.mxu1 %v5403_v0 }
 0x296   : > { %4703 = vmatpush3.bf16.msra.mxu1 %v5901_v51 }
 0x297   : > { %4704 = vmatprep.subr.bf16.mxu1 %v5403_v0 }
 0x29a   : > { %4706 = vmatpush3.bf16.msra.mxu1 %v5975_v38 }
 0x29b   : > { %4707 = vmatprep.subr.bf16.mxu1 %v5403_v0 }
 0x29e   : > { %4709 = vmatpush3.bf16.msra.mxu1 %v5979_v62 }
 0x29f   : > { %4710 = vmatprep.subr.bf16.mxu1 %v5403_v0 }
 0x2a2   : > { %4712 = vmatpush3.bf16.msra.mxu1 %v5993_v37 }
 0x2a3   : > { %4713 = vmatprep.subr.bf16.mxu1 %v5403_v0 }
 0x2a5   : > { %3981 = vmatmul.mubr.f32.vlgmr.msra.gmra.mrb[6].mxu1 %v1178_v15 }
 0x2a6   : > { %4715 = vmatpush3.bf16.msra.mxu1 %v4714_v46  ;;  %4015 = vmatprep.mubr.msk.f32.mxu1 %vm5404_vm0, %v5405_v1  ;;  %v6223_v46 = vpack.c.bf16 %v1794_v59, %v1791_v55 }
 0x2a7   : > { %4716 = vmatprep.subr.bf16.mxu1 %v5403_v0 }
 0x2aa   : > { %4718 = vmatpush3.bf16.msra.mxu1 %v4717_v21  ;;  %v1753_v21 = vld [vmem:[#allocation8 + $0x50] sm:$0xff] }
 0x2ab   : > { %4719 = vmatprep.subr.bf16.mxu1 %v5403_v0 }
 0x2ae   : > { %4721 = vmatpush3.bf16.msra.mxu1 %v4720_v33  ;;  %v1754_v33 = vld [vmem:[#allocation8 + $0x58] sm:$0xff] }
 0x2af   : > { %4722 = vmatprep.subr.bf16.mxu1 %v5403_v0 }
 0x2b2   : > { %4724 = vmatpush3.bf16.msra.mxu1 %v4723_v42  ;;  %v1797_v42 = vand.u32 4294901760, %v1753_v21 }
 0x2b3   : > { %4725 = vmatprep.subr.bf16.mxu1 %v5403_v0 }
 0x2b6   : > { %4727 = vmatpush3.bf16.msra.mxu1 %v4726_v48  ;;  %v1800_v48 = vand.u32 4294901760, %v1754_v33 }
 0x2b7   : > { %4728 = vmatprep.subr.bf16.mxu1 %v5403_v0 }
 0x2b8   : > { %v6227_v56 = vpack.c.bf16 %v1800_v48, %v1797_v42 }
 0x2ba   : > { %4730 = vmatpush3.bf16.msra.mxu1 %v4729_v19  ;;  %v1755_v19 = vld [vmem:[#allocation8 + $0x60] sm:$0xff] }
 0x2bb   : > { %4731 = vmatprep.subr.bf16.mxu1 %v5403_v0  ;;  %v1803_v43 = vand.u32 4294901760, %v1755_v19 }
 0x2bd   : > { %v6249_v3 = vsub.f32 %v1755_v19, %v1803_v43 }
 0x2be   : > { %4733 = vmatpush3.bf16.msra.mxu1 %v4732_v44  ;;  %v1806_v44 = vand.u32 4294901760, %v1756_v20 }
 0x2bf   : > { %4734 = vmatprep.subr.bf16.mxu1 %v5403_v0 }
 0x2c0   : > { %v6247_v2 = vpack.c.bf16 %v1806_v44, %v1803_v43  ;;  %v6251_v4 = vsub.f32 %v1756_v20, %v1806_v44 }
 0x2c2   : > { %4736 = vmatpush3.bf16.msra.mxu1 %v4735_v35  ;;  %v6235_v35 = vsub.f32 %v1749_v61, %v1785_v6  ;;  %v1896_v61 = vsub.f32 %v6233_v27, %v6813_v9 }
 0x2c3   : > { %4737 = vmatprep.subr.bf16.mxu1 %v5403_v0 }
 0x2c5   : > { %4016 = vmatmul.mubr.f32.vlgmr.msra.gmra.mrb[8].mxu1 %v6084_v54 }
 0x2c6   : > { %4739 = vmatpush3.bf16.msra.mxu1 %v5855_v47  ;;  %4050 = vmatprep.mubr.msk.f32.mxu1 %vm5404_vm0, %v5405_v1 }
 0x2c7   : > { %4740 = vmatprep.subr.bf16.mxu1 %v5403_v0 }
 0x2ca   : > { %4742 = vmatpush3.bf16.msra.mxu1 %v5865_v53 }
 0x2cb   : > { %4743 = vmatprep.subr.bf16.mxu1 %v5403_v0 }
 0x2ce   : > { %4745 = vmatpush3.bf16.msra.mxu1 %v5887_v5  ;;  %v3218_v5 = vld [vmem:[%s6787_s4] ss:$0 sm:$0xff] }
 0x2cf   : > { %4746 = vmatprep.subr.bf16.mxu1 %v5403_v0 }
 0x2d2   : > { %4748 = vmatpush3.bf16.msra.mxu1 %v5894_v8 }
 0x2d3   : > { %4749 = vmatprep.subr.bf16.mxu1 %v5403_v0 }
 0x2d6   : > { %4751 = vmatpush3.bf16.msra.mxu1 %v5901_v51 }
 0x2d7   : > { %4752 = vmatprep.subr.bf16.mxu1 %v5403_v0 }
 0x2da   : > { %4754 = vmatpush3.bf16.msra.mxu1 %v5975_v38 }
 0x2db   : > { %4755 = vmatprep.subr.bf16.mxu1 %v5403_v0 }
 0x2de   : > { %4757 = vmatpush3.bf16.msra.mxu1 %v5979_v62 }
 0x2df   : > { %4758 = vmatprep.subr.bf16.mxu1 %v5403_v0 }
 0x2e2   : > { %4760 = vmatpush3.bf16.msra.mxu1 %v5993_v37  ;;  %v1746_v37 = vld [vmem:[#allocation8 + $0x18] sm:$0xff] }
 0x2e3   : > { %4905 = vmatprep.subr.bf16.mxu1 %v5403_v0  ;;  %v1776_v40 = vand.u32 4294901760, %v1746_v37 }
 0x2e5   : > { %4051 = vmatmul.mubr.f32.vlgmr.msra.gmra.mrb[10].mxu1 %v6084_v54  ;;  %v6202_v7 = vsub.f32 %v1746_v37, %v1776_v40  ;;  %v6205_v50 = vpack.c.bf16 %v1776_v40, %v1773_v39  ;;  %v1860_v37 = vand.u32 4294901760, %v6196_v24  ;;  %v1867_v39 = vand.u32 4294901760, %v6198_v17 }
 0x2e6   : > { %4295 = vmatprep.mubr.msk.f32.mxu1 %vm5404_vm0, %v5405_v1 }
 0x2e7   : > { %4766 = vmatpush3.bf16.msra.mxu0 %v6205_v50 }
 0x2e8   : > { %4767 = vmatprep.subr.bf16.mxu0 %v5403_v0 }
 0x2eb   : > { %4769 = vmatpush3.bf16.msra.mxu0 %v6215_v25 }
 0x2ec   : > { %4770 = vmatprep.subr.bf16.mxu0 %v5403_v0 }
 0x318   : > { %v1182_v47 = vpop.f32.mrb[0].mxu1 }
 0x319   : > { %v3877_v53 = vpop.f32.mrb[1].mxu1  ;;  %v1183_v8 = vadd.f32 %v3218_v5, %v1182_v47  ;;  %v6237_v47 = vsub.f32 %v1750_v57, %v1788_v22  ;;  %v1758_v5 = vld [vmem:[#allocation8 + $0x78] sm:$0xff]  ;;  %v1890_v57 = vand.u32 4294901760, %v1889_v11 }
 0x31a   : > { %v1757_v53 = vld [vmem:[#allocation8 + $0x70] sm:$0xff]  ;;  %v1812_v36 = vand.u32 4294901760, %v1758_v5 }
 0x31b   : > { %v1809_v29 = vand.u32 4294901760, %v1757_v53 }
 0x31d   : > { %v6256_v40 = vsub.f32 %v1757_v53, %v1809_v29 }
 0x338   : > { %v1333_v51 = vpop.f32.mrb[2].mxu1 }
 0x339   : > { %v1334_v38 = vadd.f32 %v1333_v51, %v1183_v8  ;;  %v3912_v62 = vpop.f32.mrb[3].mxu1  ;;  %v6239_v8 = vsub.f32 %v1751_v12, %v1791_v55  ;;  %v6241_v51 = vsub.f32 %v1752_v13, %v1794_v59  ;;  %v6811_v12 = vand.u32 4294901760, %v6237_v47 }
 0x33a   : > { %v6245_v62 = vsub.f32 %v1754_v33, %v1800_v48 }
 0x33b   : > { %v1910_v59 = vsub.f32 %v6237_v47, %v6811_v12  ;;  %v6809_v48 = vand.u32 4294901760, %v6241_v51 }
 0x33d   : > { %v1911_v33 = vand.u32 4294901760, %v1910_v59  ;;  %v1924_v43 = vsub.f32 %v6241_v51, %v6809_v48 }
 0x33f   : > { %v1925_v53 = vand.u32 4294901760, %v1924_v43 }
 0x358   : > { %v1437_v52 = vpop.f32.mrb[4].mxu1 }
 0x359   : > { %v1438_v18 = vadd.f32 %v1437_v52, %v1334_v38  ;;  %v3947_v26 = vpop.f32.mrb[5].mxu1  ;;  %v6243_v38 = vsub.f32 %v1753_v21, %v1797_v42  ;;  %v6259_v52 = vpack.c.bf16 %v1812_v36, %v1809_v29  ;;  %v6810_v42 = vand.u32 4294901760, %v6239_v8 }
 0x35a   : > { %v1861_v26 = vsub.f32 %v6196_v24, %v1860_v37  ;;  %v6807_v29 = vand.u32 4294901760, %v6245_v62 }
 0x35b   : > { %v1917_v20 = vsub.f32 %v6239_v8, %v6810_v42  ;;  %v2417_v42 = vld [vmem:[#allocation10 + $0x48] sm:$0xff] }
 0x35d   : > { %v1918_v44 = vand.u32 4294901760, %v1917_v20 }
 0x378   : > { %v1526_v45 = vpop.f32.mrb[6].mxu1 }
 0x379   : > { %v1527_v63 = vadd.f32 %v1526_v45, %v1438_v18  ;;  %v3982_v30 = vpop.f32.mrb[7].mxu1  ;;  %v6261_v18 = vsub.f32 %v1758_v5, %v1812_v36  ;;  %v1868_v45 = vsub.f32 %v6198_v17, %v1867_v39  ;;  %v6808_v5 = vand.u32 4294901760, %v6243_v38 }
 0x37a   : > { %v4798_v36 = vpack.c.bf16 %v1925_v53, %v1918_v44  ;;  %v4810_v53 = vpack.c.bf16 %v6198_v17, %v6196_v24  ;;  %v6846_v24 = vand.u32 4294901760, %v6231_v14  ;;  %v6847_v17 = vand.u32 4294901760, %v6233_v27 }
 0x37b   : > { %v1869_v30 = vand.u32 4294901760, %v1868_v45  ;;  %v1938_v45 = vsub.f32 %v6245_v62, %v6807_v29 }
 0x398   : > { %v1645_v34 = vpop.f32.mrb[8].mxu1 }
 0x399   : > { %v1646_v41 = vadd.f32 %v1645_v34, %v1527_v63  ;;  %v4017_v15 = vpop.f32.mrb[9].mxu1  ;;  %v1862_v63 = vand.u32 4294901760, %v1861_v26  ;;  %v6816_v34 = vand.u32 4294901760, %v6200_v49  ;;  %v1931_v26 = vsub.f32 %v6243_v38, %v6808_v5 }
 0x39b   : > { %v6273_v15 = vpack.c.bf16 %v1869_v30, %v1862_v63  ;;  %v1932_v63 = vand.u32 4294901760, %v1931_v26  ;;  %v1939_v30 = vand.u32 4294901760, %v1938_v45  ;;  %v4813_v26 = vpack.c.bf16 %v6202_v7, %v6200_v49 }
 0x39c   : > { %v4816_v45 = vpack.c.bf16 %v6233_v27, %v6231_v14  ;;  %v6852_v14 = vand.u32 4294901760, %v6243_v38  ;;  %v6853_v27 = vand.u32 4294901760, %v6245_v62 }
 0x3b8   : > { %v1732_v16 = vpop.f32.mrb[10].mxu1 }
 0x3b9   : > { %v1733_v28 = vadd.f32 %v1732_v16, %v1646_v41  ;;  %v4052_v54 = vpop.f32.mrb[11].mxu1  ;;  %v6815_v41 = vand.u32 4294901760, %v6202_v7  ;;  %v1875_v16 = vsub.f32 %v6200_v49, %v6816_v34 }
 0x3bb   : > { %v6211_v58 = vadd.f32 %v1733_v28, %v5722_v23  ;;  %v6219_v23 = vpack.c.bf16 %v1788_v22, %v1785_v6  ;;  %v1882_v28 = vsub.f32 %v6202_v7, %v6815_v41  ;;  %v1876_v54 = vand.u32 4294901760, %v1875_v16 }
 0x3bc   : > { %v1897_v6 = vand.u32 4294901760, %v1896_v61  ;;  %v6812_v22 = vand.u32 4294901760, %v6235_v35  ;;  %v6806_v16 = vand.u32 4294901760, %v6249_v3 }
 0x3bd   : > { %v1737_v60 = vmul.f32 %v6211_v58, %v6211_v58  ;;  %4772 = vmatpush3.bf16.msra.mxu0 %v6219_v23 }
 0x3be   : > { %4773 = vmatprep.subr.bf16.mxu0 %v5403_v0  ;;  %v4792_v13 = vpack.c.bf16 %v1897_v6, %v1890_v57  ;;  %v1903_v55 = vsub.f32 %v6235_v35, %v6812_v22  ;;  %v6804_v6 = vand.u32 4294901760, %v6256_v40 }
 0x3bf   : > { %1738 = vadd.xlane.f32.xlu0 %v1737_v60  ;;  %v1883_v60 = vand.u32 4294901760, %v1882_v28  ;;  %v6805_v28 = vand.u32 4294901760, %v6251_v4 }
 0x3c0   : > { %v1904_v21 = vand.u32 4294901760, %v1903_v55  ;;  %v6803_v55 = vand.u32 4294901760, %v6261_v18 }
 0x3c1   : > { %4775 = vmatpush3.bf16.msra.mxu0 %v6223_v46  ;;  %v4789_v10 = vpack.c.bf16 %v1883_v60, %v1876_v54  ;;  %v4801_v54 = vpack.c.bf16 %v1939_v30, %v1932_v63  ;;  %v1945_v60 = vsub.f32 %v6249_v3, %v6806_v16  ;;  %v1952_v11 = vsub.f32 %v6251_v4, %v6805_v28 }
 0x3c2   : > { %4776 = vmatprep.subr.bf16.mxu0 %v5403_v0  ;;  %v4795_v19 = vpack.c.bf16 %v1911_v33, %v1904_v21  ;;  %v1959_v21 = vsub.f32 %v6256_v40, %v6804_v6  ;;  %v1966_v33 = vsub.f32 %v6261_v18, %v6803_v55  ;;  %v4819_v63 = vpack.c.bf16 %v6237_v47, %v6235_v35 }
 0x3c3   : > { %v1946_v61 = vand.u32 4294901760, %v1945_v60  ;;  %v1953_v57 = vand.u32 4294901760, %v1952_v11  ;;  %v4822_v30 = vpack.c.bf16 %v6241_v51, %v6239_v8  ;;  %v4825_v60 = vpack.c.bf16 %v6245_v62, %v6243_v38  ;;  %v2421_v62 = vld [vmem:[#allocation10 + $0x68] sm:$0xff] }
 0x3c4   : > { %v1960_v20 = vand.u32 4294901760, %v1959_v21  ;;  %v1967_v43 = vand.u32 4294901760, %v1966_v33  ;;  %v4828_v11 = vpack.c.bf16 %v6251_v4, %v6249_v3 }
 0x3c5   : > { %4778 = vmatpush3.bf16.msra.mxu0 %v6227_v56  ;;  %v4804_v59 = vpack.c.bf16 %v1953_v57, %v1946_v61  ;;  %v4831_v61 = vpack.c.bf16 %v6261_v18, %v6256_v40 }
 0x3c6   : > { %4779 = vmatprep.subr.bf16.mxu0 %v5403_v0  ;;  %v4807_v44 = vpack.c.bf16 %v1967_v43, %v1960_v20 }
 0x3c9   : > { %4781 = vmatpush3.bf16.msra.mxu0 %v6247_v2 }
 0x3ca   : > { %4782 = vmatprep.subr.bf16.mxu0 %v5403_v0 }
 0x3cd   : > { %4784 = vmatpush3.bf16.msra.mxu0 %v6259_v52 }
 0x3ce   : > { %4785 = vmatprep.subr.bf16.mxu0 %v5403_v0 }
 0x44c   : > { %v1739_v57 = vpop.xlane.xlu0 %1738 }
 0x44d   : > { %v1740_v21 = vmax.f32 %v1739_v57, 1e-12 }
 0x44f   : > { %5174 = vrsqrt.f32 %v1740_v21  ;;  %v2414_v21 = vld [vmem:[#allocation10 + $0x30] sm:$0xff] }
 0x450   : > { %v2450_v41 = vand.u32 4294901760, %v2414_v21 }
 0x459   : > { %v5175_v33 = vpop.eup %5174 }
 0x45a   : > { %v1742_v20 = vmul.f32 %v5175_v33, %v6211_v58  ;;  %v2408_v58 = vld [vmem:[#allocation10] sm:$0xff]  ;;  %v2415_v33 = vld [vmem:[#allocation10 + $0x38] sm:$0xff] }
 0x45b   : > { %v2453_v34 = vand.u32 4294901760, %v2415_v33 }
 0x45c   : > { %v6346_v43 = vand.u32 4294901760, %v1742_v20 }
 0x45e   : > { %v6349_v55 = vsub.f32 %v1742_v20, %v6346_v43  ;;  %v2416_v20 = vld [vmem:[#allocation10 + $0x40] sm:$0xff] }
 0x460   : > { %v1849_v6 = vand.u32 4294901760, %v6349_v55 }
 0x462   : > { %v1850_v28 = vsub.f32 %v6349_v55, %v1849_v6 }
 0x464   : > { %v1851_v16 = vand.u32 4294901760, %v1850_v28  ;;  %v2412_v28 = vld [vmem:[#allocation10 + $0x20] sm:$0xff] }
 0x466   : > { %4086 = vmatmul.mubr.f32.vlgmr.msra.gmra.mrb[2].mxu0 %v1851_v16 }
 0x467   : > { %4787 = vmatpush3.bf16.msra.mxu0 %v6273_v15  ;;  %4120 = vmatprep.mubr.msk.f32.mxu0 %vm5404_vm0, %v5405_v1  ;;  %v2409_v15 = vld [vmem:[#allocation10 + $0x8] sm:$0xff] }
 0x468   : > { %4788 = vmatprep.subr.bf16.mxu0 %v5403_v0 }
 0x46b   : > { %4790 = vmatpush3.bf16.msra.mxu0 %v4789_v10  ;;  %v2410_v10 = vld [vmem:[#allocation10 + $0x10] sm:$0xff] }
 0x46c   : > { %4791 = vmatprep.subr.bf16.mxu0 %v5403_v0  ;;  %v2438_v16 = vand.u32 4294901760, %v2410_v10 }
 0x46e   : > { %v6376_v48 = vsub.f32 %v2410_v10, %v2438_v16  ;;  %v6389_v10 = vsub.f32 %v2414_v21, %v2450_v41 }
 0x46f   : > { %4793 = vmatpush3.bf16.msra.mxu0 %v4792_v13  ;;  %v2432_v13 = vand.u32 4294901760, %v2408_v58 }
 0x470   : > { %4794 = vmatprep.subr.bf16.mxu0 %v5403_v0 }
 0x473   : > { %4796 = vmatpush3.bf16.msra.mxu0 %v4795_v19  ;;  %v2435_v19 = vand.u32 4294901760, %v2409_v15 }
 0x474   : > { %4797 = vmatprep.subr.bf16.mxu0 %v5403_v0 }
 0x475   : > { %v6370_v29 = vpack.c.bf16 %v2435_v19, %v2432_v13  ;;  %v6374_v5 = vsub.f32 %v2409_v15, %v2435_v19  ;;  %v2459_v15 = vand.u32 4294901760, %v2417_v42 }
 0x477   : > { %4799 = vmatpush3.bf16.msra.mxu0 %v4798_v36  ;;  %v2411_v36 = vld [vmem:[#allocation10 + $0x18] sm:$0xff]  ;;  %4907 = vmatpush3.bf16.msra.mxu1 %v6370_v29 }
 0x478   : > { %4800 = vmatprep.subr.bf16.mxu0 %v5403_v0  ;;  %4908 = vmatprep.subr.bf16.mxu1 %v5403_v0 }
 0x47b   : > { %4802 = vmatpush3.bf16.msra.mxu0 %v4801_v54  ;;  %v2413_v54 = vld [vmem:[#allocation10 + $0x28] sm:$0xff] }
 0x47c   : > { %4803 = vmatprep.subr.bf16.mxu0 %v5403_v0  ;;  %v2447_v57 = vand.u32 4294901760, %v2413_v54 }
 0x47e   : > { %v6385_v31 = vsub.f32 %v2413_v54, %v2447_v57 }
 0x47f   : > { %4805 = vmatpush3.bf16.msra.mxu0 %v4804_v59  ;;  %v2441_v59 = vand.u32 4294901760, %v2411_v36 }
 0x480   : > { %4806 = vmatprep.subr.bf16.mxu0 %v5403_v0 }
 0x481   : > { %v6378_v12 = vpack.c.bf16 %v2441_v59, %v2438_v16  ;;  %v6380_v22 = vsub.f32 %v2411_v36, %v2441_v59  ;;  %v6395_v36 = vsub.f32 %v2417_v42, %v2459_v15  ;;  %v6409_v42 = vpack.c.bf16 %v2453_v34, %v2450_v41 }
 0x482   : > { %v6844_v41 = vand.u32 4294901760, %v6200_v49  ;;  %v6849_v49 = vand.u32 4294901760, %v6237_v47  ;;  %v6855_v47 = vand.u32 4294901760, %v6251_v4  ;;  %v2422_v4 = vld [vmem:[#allocation10 + $0x70] sm:$0xff] }
 0x483   : > { %4808 = vmatpush3.bf16.msra.mxu0 %v4807_v44  ;;  %v2444_v44 = vand.u32 4294901760, %v2412_v28  ;;  %4910 = vmatpush3.bf16.msra.mxu1 %v6378_v12 }
 0x484   : > { %4809 = vmatprep.subr.bf16.mxu0 %v5403_v0  ;;  %4911 = vmatprep.subr.bf16.mxu1 %v5403_v0 }
 0x485   : > { %v6382_v9 = vsub.f32 %v2412_v28, %v2444_v44  ;;  %v2532_v28 = vand.u32 4294901760, %v6374_v5 }
 0x486   : > { %4121 = vmatmul.mubr.f32.vlgmr.msra.gmra.mrb[2].mxu0 %v6346_v43 }
 0x487   : > { %4811 = vmatpush3.bf16.msra.mxu0 %v4810_v53  ;;  %4155 = vmatprep.mubr.msk.f32.mxu0 %vm5404_vm0, %v5405_v1  ;;  %v6372_v53 = vsub.f32 %v2408_v58, %v2432_v13  ;;  %v2456_v58 = vand.u32 4294901760, %v2416_v20  ;;  %v6391_v13 = vsub.f32 %v2415_v33, %v2453_v34  ;;  %v4858_v34 = vpack.c.bf16 %v1867_v39, %v1860_v37 }
 0x488   : > { %4812 = vmatprep.subr.bf16.mxu0 %v5403_v0  ;;  %v4864_v37 = vpack.c.bf16 %v6847_v17, %v6846_v24  ;;  %v6848_v39 = vand.u32 4294901760, %v6235_v35  ;;  %v6854_v35 = vand.u32 4294901760, %v6249_v3  ;;  %v2471_v3 = vand.u32 4294901760, %v2421_v62 }
 0x489   : > { %v6393_v19 = vsub.f32 %v2416_v20, %v2456_v58 }
 0x48a   : > { %v6541_v20 = vsub.f32 %v2421_v62, %v2471_v3 }
 0x48b   : > { %4814 = vmatpush3.bf16.msra.mxu0 %v4813_v26  ;;  %v6401_v26 = vpack.c.bf16 %v2447_v57, %v2444_v44  ;;  %v2533_v44 = vsub.f32 %v6374_v5, %v2532_v28 }
 0x48c   : > { %4815 = vmatprep.subr.bf16.mxu0 %v5403_v0 }
 0x48d   : > { %4913 = vmatpush3.bf16.msra.mxu1 %v6401_v26 }
 0x48e   : > { %4914 = vmatprep.subr.bf16.mxu1 %v5403_v0 }
 0x48f   : > { %4817 = vmatpush3.bf16.msra.mxu0 %v4816_v45  ;;  %v6417_v45 = vpack.c.bf16 %v2459_v15, %v2456_v58 }
 0x490   : > { %4818 = vmatprep.subr.bf16.mxu0 %v5403_v0 }
 0x491   : > { %4916 = vmatpush3.bf16.msra.mxu1 %v6409_v42 }
 0x492   : > { %4917 = vmatprep.subr.bf16.mxu1 %v5403_v0 }
 0x493   : > { %4820 = vmatpush3.bf16.msra.mxu0 %v4819_v63  ;;  %v6845_v63 = vand.u32 4294901760, %v6202_v7  ;;  %v4867_v7 = vpack.c.bf16 %v6849_v49, %v6848_v39  ;;  %v2553_v39 = vand.u32 4294901760, %v6382_v9  ;;  %v2560_v49 = vand.u32 4294901760, %v6385_v31 }
 0x494   : > { %4821 = vmatprep.subr.bf16.mxu0 %v5403_v0 }
 0x495   : > { %4919 = vmatpush3.bf16.msra.mxu1 %v6417_v45 }
 0x496   : > { %4920 = vmatprep.subr.bf16.mxu1 %v5403_v0 }
 0x497   : > { %4823 = vmatpush3.bf16.msra.mxu0 %v4822_v30  ;;  %v4861_v30 = vpack.c.bf16 %v6845_v63, %v6844_v41  ;;  %v2534_v41 = vand.u32 4294901760, %v2533_v44  ;;  %v2539_v63 = vand.u32 4294901760, %v6376_v48 }
 0x498   : > { %4824 = vmatprep.subr.bf16.mxu0 %v5403_v0 }
 0x499   : > { %v2540_v17 = vsub.f32 %v6376_v48, %v2539_v63 }
 0x49b   : > { %4826 = vmatpush3.bf16.msra.mxu0 %v4825_v60 }
 0x49c   : > { %4827 = vmatprep.subr.bf16.mxu0 %v5403_v0 }
 0x49f   : > { %4829 = vmatpush3.bf16.msra.mxu0 %v4828_v11  ;;  %v4873_v11 = vpack.c.bf16 %v6853_v27, %v6852_v14 }
 0x4a0   : > { %4830 = vmatprep.subr.bf16.mxu0 %v5403_v0 }
 0x4a3   : > { %4832 = vmatpush3.bf16.msra.mxu0 %v4831_v61  ;;  %v4876_v61 = vpack.c.bf16 %v6855_v47, %v6854_v35  ;;  %v2567_v35 = vand.u32 4294901760, %v6389_v10  ;;  %v2574_v47 = vand.u32 4294901760, %v6391_v13 }
 0x4a4   : > { %4833 = vmatprep.subr.bf16.mxu0 %v5403_v0 }
 0x4a6   : > { %4156 = vmatmul.mubr.f32.vlgmr.msra.gmra.mrb[2].mxu0 %v6349_v55  ;;  %v6851_v55 = vand.u32 4294901760, %v6241_v51  ;;  %v6857_v51 = vand.u32 4294901760, %v6261_v18 }
 0x4a7   : > { %4835 = vmatpush3.bf16.msra.mxu0 %v6194_v32  ;;  %4190 = vmatprep.mubr.msk.f32.mxu0 %vm5404_vm0, %v5405_v1 }
 0x4a8   : > { %4836 = vmatprep.subr.bf16.mxu0 %v5403_v0 }
 0x4ab   : > { %4838 = vmatpush3.bf16.msra.mxu0 %v6205_v50 }
 0x4ac   : > { %4839 = vmatprep.subr.bf16.mxu0 %v5403_v0 }
 0x4af   : > { %4841 = vmatpush3.bf16.msra.mxu0 %v6215_v25 }
 0x4b0   : > { %4842 = vmatprep.subr.bf16.mxu0 %v5403_v0 }
 0x4b3   : > { %4844 = vmatpush3.bf16.msra.mxu0 %v6219_v23 }
 0x4b4   : > { %4845 = vmatprep.subr.bf16.mxu0 %v5403_v0 }
 0x4b7   : > { %4847 = vmatpush3.bf16.msra.mxu0 %v6223_v46 }
 0x4b8   : > { %4848 = vmatprep.subr.bf16.mxu0 %v5403_v0 }
 0x4bb   : > { %4850 = vmatpush3.bf16.msra.mxu0 %v6227_v56 }
 0x4bc   : > { %4851 = vmatprep.subr.bf16.mxu0 %v5403_v0 }
 0x4bf   : > { %4853 = vmatpush3.bf16.msra.mxu0 %v6247_v2 }
 0x4c0   : > { %4854 = vmatprep.subr.bf16.mxu0 %v5403_v0 }
 0x4c3   : > { %4856 = vmatpush3.bf16.msra.mxu0 %v6259_v52 }
 0x4c4   : > { %4857 = vmatprep.subr.bf16.mxu0 %v5403_v0 }
 0x4c6   : > { %4191 = vmatmul.mubr.f32.vlgmr.msra.gmra.mrb[2].mxu0 %v1849_v6  ;;  %v6850_v6 = vand.u32 4294901760, %v6239_v8  ;;  %v6856_v8 = vand.u32 4294901760, %v6256_v40  ;;  %v2423_v40 = vld [vmem:[#allocation10 + $0x78] sm:$0xff] }
 0x4c7   : > { %4859 = vmatpush3.bf16.msra.mxu0 %v4858_v34  ;;  %4225 = vmatprep.mubr.msk.f32.mxu0 %vm5404_vm0, %v5405_v1  ;;  %v2477_v18 = vand.u32 4294901760, %v2423_v40 }
 0x4c8   : > { %4860 = vmatprep.subr.bf16.mxu0 %v5403_v0  ;;  %v4870_v60 = vpack.c.bf16 %v6851_v55, %v6850_v6  ;;  %v4879_v16 = vpack.c.bf16 %v6857_v51, %v6856_v8  ;;  %v2554_v55 = vsub.f32 %v6382_v9, %v2553_v39  ;;  %v2568_v8 = vsub.f32 %v6389_v10, %v2567_v35 }
 0x4c9   : > { %v6546_v15 = vsub.f32 %v2423_v40, %v2477_v18  ;;  %v2575_v51 = vsub.f32 %v6391_v13, %v2574_v47 }
 0x4ca   : > { %v2555_v27 = vand.u32 4294901760, %v2554_v55 }
 0x4cb   : > { %4862 = vmatpush3.bf16.msra.mxu0 %v4861_v30  ;;  %v2546_v30 = vand.u32 4294901760, %v6380_v22 }
 0x4cc   : > { %4863 = vmatprep.subr.bf16.mxu0 %v5403_v0 }
 0x4cf   : > { %4865 = vmatpush3.bf16.msra.mxu0 %v4864_v37  ;;  %v2547_v37 = vsub.f32 %v6380_v22, %v2546_v30 }
 0x4d0   : > { %4866 = vmatprep.subr.bf16.mxu0 %v5403_v0 }
 0x4d1   : > { %v2548_v6 = vand.u32 4294901760, %v2547_v37 }
 0x4d3   : > { %4868 = vmatpush3.bf16.msra.mxu0 %v4867_v7  ;;  %v2541_v7 = vand.u32 4294901760, %v2540_v17  ;;  %v6819_v17 = vand.u32 4294901760, %v6541_v20 }
 0x4d4   : > { %4869 = vmatprep.subr.bf16.mxu0 %v5403_v0 }
 0x4d5   : > { %v4933_v14 = vpack.c.bf16 %v2548_v6, %v2541_v7  ;;  %v2617_v6 = vsub.f32 %v6541_v20, %v6819_v17 }
 0x4d7   : > { %4871 = vmatpush3.bf16.msra.mxu0 %v4870_v60  ;;  %v2561_v60 = vsub.f32 %v6385_v31, %v2560_v49 }
 0x4d8   : > { %4872 = vmatprep.subr.bf16.mxu0 %v5403_v0 }
 0x4db   : > { %4874 = vmatpush3.bf16.msra.mxu0 %v4873_v11  ;;  %v2562_v11 = vand.u32 4294901760, %v2561_v60  ;;  %v2618_v60 = vand.u32 4294901760, %v2617_v6 }
 0x4dc   : > { %4875 = vmatprep.subr.bf16.mxu0 %v5403_v0 }
 0x4df   : > { %4877 = vmatpush3.bf16.msra.mxu0 %v4876_v61  ;;  %v4936_v61 = vpack.c.bf16 %v2562_v11, %v2555_v27  ;;  %v6817_v11 = vand.u32 4294901760, %v6546_v15 }
 0x4e0   : > { %4878 = vmatprep.subr.bf16.mxu0 %v5403_v0 }
 0x4e3   : > { %4880 = vmatpush3.bf16.msra.mxu0 %v4879_v16  ;;  %v2569_v16 = vand.u32 4294901760, %v2568_v8 }
 0x4e4   : > { %4881 = vmatprep.subr.bf16.mxu0 %v5403_v0 }
 0x4e6   : > { %4226 = vmatmul.mubr.f32.vlgmr.msra.gmra.mrb[2].mxu0 %v6346_v43 }
 0x4e7   : > { %4883 = vmatpush3.bf16.msra.mxu0 %v6194_v32  ;;  %4260 = vmatprep.mubr.msk.f32.mxu0 %vm5404_vm0, %v5405_v1  ;;  %v2418_v32 = vld [vmem:[#allocation10 + $0x50] sm:$0xff] }
 0x4e8   : > { %4884 = vmatprep.subr.bf16.mxu0 %v5403_v0 }
 0x4eb   : > { %4886 = vmatpush3.bf16.msra.mxu0 %v6205_v50  ;;  %v2419_v50 = vld [vmem:[#allocation10 + $0x58] sm:$0xff] }
 0x4ec   : > { %4887 = vmatprep.subr.bf16.mxu0 %v5403_v0 }
 0x4ef   : > { %4889 = vmatpush3.bf16.msra.mxu0 %v6215_v25  ;;  %v2462_v25 = vand.u32 4294901760, %v2418_v32 }
 0x4f0   : > { %4890 = vmatprep.subr.bf16.mxu0 %v5403_v0 }
 0x4f1   : > { %v6535_v57 = vsub.f32 %v2418_v32, %v2462_v25  ;;  %v2576_v32 = vand.u32 4294901760, %v2575_v51 }
 0x4f3   : > { %4892 = vmatpush3.bf16.msra.mxu0 %v6219_v23  ;;  %v2465_v23 = vand.u32 4294901760, %v2419_v50 }
 0x4f4   : > { %4893 = vmatprep.subr.bf16.mxu0 %v5403_v0 }
 0x4f5   : > { %v6517_v38 = vpack.c.bf16 %v2465_v23, %v2462_v25  ;;  %v6537_v21 = vsub.f32 %v2419_v50, %v2465_v23  ;;  %v2581_v50 = vand.u32 4294901760, %v6393_v19  ;;  %v2588_v25 = vand.u32 4294901760, %v6395_v36 }
 0x4f6   : > { %v4939_v23 = vpack.c.bf16 %v2576_v32, %v2569_v16  ;;  %v2631_v16 = vsub.f32 %v6546_v15, %v6817_v11 }
 0x4f7   : > { %4895 = vmatpush3.bf16.msra.mxu0 %v6223_v46  ;;  %v2420_v46 = vld [vmem:[#allocation10 + $0x60] sm:$0xff]  ;;  %4922 = vmatpush3.bf16.msra.mxu1 %v6517_v38  ;;  %v2589_v62 = vsub.f32 %v6395_v36, %v2588_v25  ;;  %v2602_v40 = vand.u32 4294901760, %v6537_v21 }
 0x4f8   : > { %4896 = vmatprep.subr.bf16.mxu0 %v5403_v0  ;;  %4923 = vmatprep.subr.bf16.mxu1 %v5403_v0 }
 0x4fb   : > { %4898 = vmatpush3.bf16.msra.mxu0 %v6227_v56  ;;  %v2468_v56 = vand.u32 4294901760, %v2420_v46 }
 0x4fc   : > { %4899 = vmatprep.subr.bf16.mxu0 %v5403_v0 }
 0x4fd   : > { %v6539_v33 = vsub.f32 %v2420_v46, %v2468_v56  ;;  %v2582_v46 = vsub.f32 %v6393_v19, %v2581_v50 }
 0x4ff   : > { %4901 = vmatpush3.bf16.msra.mxu0 %v6247_v2  ;;  %v6521_v2 = vpack.c.bf16 %v2471_v3, %v2468_v56  ;;  %v2583_v56 = vand.u32 4294901760, %v2582_v46  ;;  %v2590_v3 = vand.u32 4294901760, %v2589_v62  ;;  %v2632_v46 = vand.u32 4294901760, %v2631_v16 }
 0x500   : > { %4902 = vmatprep.subr.bf16.mxu0 %v5403_v0 }
 0x501   : > { %4925 = vmatpush3.bf16.msra.mxu1 %v6521_v2 }
 0x502   : > { %4926 = vmatprep.subr.bf16.mxu1 %v5403_v0 }
 0x503   : > { %4904 = vmatpush3.bf16.msra.mxu0 %v6259_v52  ;;  %v2474_v52 = vand.u32 4294901760, %v2422_v4 }
 0x505   : > { %v6527_v54 = vpack.c.bf16 %v2477_v18, %v2474_v52  ;;  %v6544_v58 = vsub.f32 %v2422_v4, %v2474_v52  ;;  %v2595_v4 = vand.u32 4294901760, %v6535_v57  ;;  %v4942_v52 = vpack.c.bf16 %v2590_v3, %v2583_v56 }
 0x506   : > { %4261 = vmatmul.mubr.f32.vlgmr.msra.gmra.mrb[2].mxu0 %v6346_v43  ;;  %v2525_v43 = vand.u32 4294901760, %v6372_v53  ;;  %v4954_v56 = vpack.c.bf16 %v6374_v5, %v6372_v53  ;;  %v4957_v3 = vpack.c.bf16 %v6380_v22, %v6376_v48  ;;  %v5008_v5 = vpack.c.bf16 %v2560_v49, %v2553_v39 }
 0x507   : > { %4928 = vmatpush3.bf16.msra.mxu1 %v6527_v54  ;;  %v2596_v18 = vsub.f32 %v6535_v57, %v2595_v4  ;;  %v6818_v27 = vand.u32 4294901760, %v6544_v58  ;;  %v4975_v6 = vpack.c.bf16 %v6546_v15, %v6544_v58  ;;  %v5011_v22 = vpack.c.bf16 %v2574_v47, %v2567_v35 }
 0x508   : > { %v2526_v59 = vsub.f32 %v6372_v53, %v2525_v43  ;;  %4929 = vmatprep.subr.bf16.mxu1 %v5403_v0  ;;  %v5014_v48 = vpack.c.bf16 %v2588_v25, %v2581_v50  ;;  %v6859_v53 = vand.u32 4294901760, %v6541_v20 }
 0x509   : > { %v2597_v44 = vand.u32 4294901760, %v2596_v18  ;;  %v2624_v51 = vsub.f32 %v6544_v58, %v6818_v27  ;;  %v4960_v18 = vpack.c.bf16 %v6385_v31, %v6382_v9  ;;  %v5017_v31 = vpack.c.bf16 %v2602_v40, %v2595_v4 }
 0x50a   : > { %v2527_v34 = vand.u32 4294901760, %v2526_v59  ;;  %v2603_v59 = vsub.f32 %v6537_v21, %v2602_v40  ;;  %v6858_v9 = vand.u32 4294901760, %v6539_v33 }
 0x50b   : > { %v2625_v32 = vand.u32 4294901760, %v2624_v51 }
 0x50c   : > { %v6551_v24 = vpack.c.bf16 %v2534_v41, %v2527_v34  ;;  %v2604_v34 = vand.u32 4294901760, %v2603_v59  ;;  %v6820_v41 = vand.u32 4294901760, %v6539_v33  ;;  %v4963_v59 = vpack.c.bf16 %v6391_v13, %v6389_v10 }
 0x50d   : > { %v4951_v62 = vpack.c.bf16 %v2632_v46, %v2625_v32  ;;  %v5020_v10 = vpack.c.bf16 %v6859_v53, %v6858_v9  ;;  %v6860_v13 = vand.u32 4294901760, %v6544_v58 }
 0x50e   : > { %v4945_v37 = vpack.c.bf16 %v2604_v34, %v2597_v44  ;;  %v2610_v7 = vsub.f32 %v6539_v33, %v6820_v41  ;;  %v4966_v44 = vpack.c.bf16 %v6395_v36, %v6393_v19  ;;  %v4969_v34 = vpack.c.bf16 %v6537_v21, %v6535_v57 }
 0x50f   : > { %v6861_v19 = vand.u32 4294901760, %v6546_v15 }
 0x510   : > { %v2611_v55 = vand.u32 4294901760, %v2610_v7  ;;  %v4972_v7 = vpack.c.bf16 %v6541_v20, %v6539_v33 }
 0x511   : > { %v5023_v36 = vpack.c.bf16 %v6861_v19, %v6860_v13 }
 0x512   : > { %v4948_v8 = vpack.c.bf16 %v2618_v60, %v2611_v55  ;;  %v3219_v55 = vld [vmem:[%s6789_s6] ss:$0 sm:$0xff] }
 0x5d9   : > { %v2403_v60 = vpop.f32.mrb[2].mxu0 }
 0x5da   : > { %v5050_v51 = vadd.f32 %v3219_v55, %v2403_v60  ;;  %v4262_v16 = vpop.f32.mrb[3].mxu0 }
 0x5dc   : > { %v2407_v32 = vmax.f32 %v5050_v51, 0.0 }
 0x5de   : > { %v6626_v46 = vand.u32 4294901760, %v2407_v32 }
 0x5e0   : > { %v2513_v11 = vsub.f32 %v2407_v32, %v6626_v46 }
 0x5e2   : > { %v2514_v27 = vand.u32 4294901760, %v2513_v11 }
 0x5e4   : > { %v2515_v17 = vsub.f32 %v2513_v11, %v2514_v27 }
 0x5e6   : > { %v2516_v41 = vand.u32 4294901760, %v2515_v17 }
 0x5e8   : > { %4296 = vmatmul.mubr.f32.vlgmr.msra.gmra.mrb[12].mxu1 %v2516_v41 }
 0x5e9   : > { %4931 = vmatpush3.bf16.msra.mxu1 %v6551_v24  ;;  %4330 = vmatprep.mubr.msk.f32.mxu1 %vm5404_vm0, %v5405_v1  ;;  %v5002_v24 = vpack.c.bf16 %v2532_v28, %v2525_v43 }
 0x5ea   : > { %4932 = vmatprep.subr.bf16.mxu1 %v5403_v0 }
 0x5ed   : > { %4934 = vmatpush3.bf16.msra.mxu1 %v4933_v14  ;;  %v5005_v14 = vpack.c.bf16 %v2546_v30, %v2539_v63 }
 0x5ee   : > { %4935 = vmatprep.subr.bf16.mxu1 %v5403_v0 }
 0x5f1   : > { %4937 = vmatpush3.bf16.msra.mxu1 %v4936_v61 }
 0x5f2   : > { %4938 = vmatprep.subr.bf16.mxu1 %v5403_v0 }
 0x5f5   : > { %4940 = vmatpush3.bf16.msra.mxu1 %v4939_v23 }
 0x5f6   : > { %4941 = vmatprep.subr.bf16.mxu1 %v5403_v0 }
 0x5f9   : > { %4943 = vmatpush3.bf16.msra.mxu1 %v4942_v52 }
 0x5fa   : > { %4944 = vmatprep.subr.bf16.mxu1 %v5403_v0 }
 0x5fd   : > { %4946 = vmatpush3.bf16.msra.mxu1 %v4945_v37 }
 0x5fe   : > { %4947 = vmatprep.subr.bf16.mxu1 %v5403_v0 }
 0x601   : > { %4949 = vmatpush3.bf16.msra.mxu1 %v4948_v8 }
 0x602   : > { %4950 = vmatprep.subr.bf16.mxu1 %v5403_v0 }
 0x605   : > { %4952 = vmatpush3.bf16.msra.mxu1 %v4951_v62 }
 0x606   : > { %4953 = vmatprep.subr.bf16.mxu1 %v5403_v0 }
 0x608   : > { %4331 = vmatmul.mubr.f32.vlgmr.msra.gmra.mrb[12].mxu1 %v6626_v46 }
 0x609   : > { %4955 = vmatpush3.bf16.msra.mxu1 %v4954_v56  ;;  %4365 = vmatprep.mubr.msk.f32.mxu1 %vm5404_vm0, %v5405_v1 }
 0x60a   : > { %4956 = vmatprep.subr.bf16.mxu1 %v5403_v0 }
 0x60d   : > { %4958 = vmatpush3.bf16.msra.mxu1 %v4957_v3 }
 0x60e   : > { %4959 = vmatprep.subr.bf16.mxu1 %v5403_v0 }
 0x611   : > { %4961 = vmatpush3.bf16.msra.mxu1 %v4960_v18 }
 0x612   : > { %4962 = vmatprep.subr.bf16.mxu1 %v5403_v0 }
 0x615   : > { %4964 = vmatpush3.bf16.msra.mxu1 %v4963_v59 }
 0x616   : > { %4965 = vmatprep.subr.bf16.mxu1 %v5403_v0 }
 0x619   : > { %4967 = vmatpush3.bf16.msra.mxu1 %v4966_v44 }
 0x61a   : > { %4968 = vmatprep.subr.bf16.mxu1 %v5403_v0 }
 0x61d   : > { %4970 = vmatpush3.bf16.msra.mxu1 %v4969_v34 }
 0x61e   : > { %4971 = vmatprep.subr.bf16.mxu1 %v5403_v0 }
 0x621   : > { %4973 = vmatpush3.bf16.msra.mxu1 %v4972_v7 }
 0x622   : > { %4974 = vmatprep.subr.bf16.mxu1 %v5403_v0 }
 0x625   : > { %4976 = vmatpush3.bf16.msra.mxu1 %v4975_v6 }
 0x626   : > { %4977 = vmatprep.subr.bf16.mxu1 %v5403_v0 }
 0x628   : > { %4366 = vmatmul.mubr.f32.vlgmr.msra.gmra.mrb[12].mxu1 %v2513_v11 }
 0x629   : > { %4979 = vmatpush3.bf16.msra.mxu1 %v6370_v29  ;;  %4400 = vmatprep.mubr.msk.f32.mxu1 %vm5404_vm0, %v5405_v1 }
 0x62a   : > { %4980 = vmatprep.subr.bf16.mxu1 %v5403_v0 }
 0x62d   : > { %4982 = vmatpush3.bf16.msra.mxu1 %v6378_v12 }
 0x62e   : > { %4983 = vmatprep.subr.bf16.mxu1 %v5403_v0 }
 0x631   : > { %4985 = vmatpush3.bf16.msra.mxu1 %v6401_v26 }
 0x632   : > { %4986 = vmatprep.subr.bf16.mxu1 %v5403_v0 }
 0x635   : > { %4988 = vmatpush3.bf16.msra.mxu1 %v6409_v42 }
 0x636   : > { %4989 = vmatprep.subr.bf16.mxu1 %v5403_v0 }
 0x639   : > { %4991 = vmatpush3.bf16.msra.mxu1 %v6417_v45 }
 0x63a   : > { %4992 = vmatprep.subr.bf16.mxu1 %v5403_v0 }
 0x63d   : > { %4994 = vmatpush3.bf16.msra.mxu1 %v6517_v38 }
 0x63e   : > { %4995 = vmatprep.subr.bf16.mxu1 %v5403_v0 }
 0x641   : > { %4997 = vmatpush3.bf16.msra.mxu1 %v6521_v2 }
 0x642   : > { %4998 = vmatprep.subr.bf16.mxu1 %v5403_v0 }
 0x645   : > { %5000 = vmatpush3.bf16.msra.mxu1 %v6527_v54 }
 0x646   : > { %5001 = vmatprep.subr.bf16.mxu1 %v5403_v0 }
 0x648   : > { %4401 = vmatmul.mubr.f32.vlgmr.msra.gmra.mrb[12].mxu1 %v2514_v27 }
 0x649   : > { %5003 = vmatpush3.bf16.msra.mxu1 %v5002_v24  ;;  %4435 = vmatprep.mubr.msk.f32.mxu1 %vm5404_vm0, %v5405_v1 }
 0x64a   : > { %5004 = vmatprep.subr.bf16.mxu1 %v5403_v0 }
 0x64d   : > { %5006 = vmatpush3.bf16.msra.mxu1 %v5005_v14 }
 0x64e   : > { %5007 = vmatprep.subr.bf16.mxu1 %v5403_v0 }
 0x651   : > { %5009 = vmatpush3.bf16.msra.mxu1 %v5008_v5 }
 0x652   : > { %5010 = vmatprep.subr.bf16.mxu1 %v5403_v0 }
 0x655   : > { %5012 = vmatpush3.bf16.msra.mxu1 %v5011_v22 }
 0x656   : > { %5013 = vmatprep.subr.bf16.mxu1 %v5403_v0 }
 0x659   : > { %5015 = vmatpush3.bf16.msra.mxu1 %v5014_v48 }
 0x65a   : > { %5016 = vmatprep.subr.bf16.mxu1 %v5403_v0 }
 0x65d   : > { %5018 = vmatpush3.bf16.msra.mxu1 %v5017_v31 }
 0x65e   : > { %5019 = vmatprep.subr.bf16.mxu1 %v5403_v0 }
 0x661   : > { %5021 = vmatpush3.bf16.msra.mxu1 %v5020_v10 }
 0x662   : > { %5022 = vmatprep.subr.bf16.mxu1 %v5403_v0 }
 0x665   : > { %5024 = vmatpush3.bf16.msra.mxu1 %v5023_v36 }
 0x666   : > { %5025 = vmatprep.subr.bf16.mxu1 %v5403_v0 }
 0x668   : > { %4436 = vmatmul.mubr.f32.vlgmr.msra.gmra.mrb[12].mxu1 %v6626_v46 }
 0x669   : > { %5027 = vmatpush3.bf16.msra.mxu1 %v6370_v29  ;;  %4470 = vmatprep.mubr.msk.f32.mxu1 %vm5404_vm0, %v5405_v1  ;;  %v3220_v1 = vld [vmem:[%s6791_s8] ss:$0 sm:$0xff] }
 0x66a   : > { %5028 = vmatprep.subr.bf16.mxu1 %v5403_v0 }
 0x66d   : > { %5030 = vmatpush3.bf16.msra.mxu1 %v6378_v12 }
 0x66e   : > { %5031 = vmatprep.subr.bf16.mxu1 %v5403_v0 }
 0x671   : > { %5033 = vmatpush3.bf16.msra.mxu1 %v6401_v26 }
 0x672   : > { %5034 = vmatprep.subr.bf16.mxu1 %v5403_v0 }
 0x675   : > { %5036 = vmatpush3.bf16.msra.mxu1 %v6409_v42 }
 0x676   : > { %5037 = vmatprep.subr.bf16.mxu1 %v5403_v0 }
 0x679   : > { %5039 = vmatpush3.bf16.msra.mxu1 %v6417_v45 }
 0x67a   : > { %5040 = vmatprep.subr.bf16.mxu1 %v5403_v0 }
 0x67d   : > { %5042 = vmatpush3.bf16.msra.mxu1 %v6517_v38 }
 0x67e   : > { %5043 = vmatprep.subr.bf16.mxu1 %v5403_v0 }
 0x681   : > { %5045 = vmatpush3.bf16.msra.mxu1 %v6521_v2 }
 0x682   : > { %5046 = vmatprep.subr.bf16.mxu1 %v5403_v0 }
 0x685   : > { %5048 = vmatpush3.bf16.msra.mxu1 %v6527_v54 }
 0x688   : > { %4471 = vmatmul.mubr.f32.vlgmr.msra.gmra.mrb[12].mxu1 %v6626_v46 }
 0x75b   : > { %v3068_v12 = vpop.f32.mrb[12].mxu1 }
 0x75c   : > { %v5051_v29 = vadd.f32 %v3220_v1, %v3068_v12  ;;  %v4472_v26 = vpop.f32.mrb[13].mxu1 }
 0x75e   : > { %v3072_v42 = vmul.f32 %v5051_v29, %v5051_v29 }
 0x760   : > { %3073 = vadd.xlane.f32.xlu0 %v3072_v42 }
 0x7ed   : > { %v3074_v45 = vpop.xlane.xlu0 %3073 }
 0x7ee   : > { %v3075_v38 = vmax.f32 %v3074_v45, 1e-12 }
 0x7f0   : > { %5176 = vrsqrt.f32 %v3075_v38 }
 0x7fa   : > { %v5177_v0 = vpop.eup %5176 }
 0x7fb   : > { %v3077_v2 = vmul.f32 %v5177_v0, %v5051_v29 }
 0x7fd   : > { %3078 = vst [vmem:[%s405_s13] sm:$0xff] %v3077_v2 }
 0x7fe   : > { %5333 = shalt.err (!%p5330_p0)
}
 0x7ff   : > { %s5334_s1 = scalar_lea.hbm %s6739_s14, 128  ;;  %s5338_s29 = scalar_lea.hbm %s6862_s17, 256 }
 0x800   : > { %p5335_p2 = scmp.ne.s32.totalorder %s6739_s14, %s5334_s1  ;;  %p5339_p10 = scmp.lt.u32.totalorder %s6739_s14, %s6862_s17 }
 0x801   : > { %p5340_p11 = scmp.lt.u32.totalorder %s5338_s29, %s5334_s1  ;;  %p5342_p6 = scmp.lt.u32.totalorder %s5334_s1, %s6739_s14 }
 0x802   : > { %p5336_p8 = pnand %p5335_p2, %p6863_p5 }
 0x803   : > { %p5341_p1 = por %p5340_p11, %p5339_p10 }
 0x804   : > { %p5337_p4 = pneg %p5336_p8 }
 0x805   : > { %p5343_p7 = por %p5342_p6, %p5341_p1 }
 0x807   : > { %p5344_p9 = pnand %p5343_p7, %p5337_p4 }
 0x809   : > { %5347 = shalt.err (!%p5344_p9)
}
 0x80a   : > { %5100 = dma.vmem_to_hbm [thread:$0]  (%p6863_p5), %s6741_s26, 128, %s6739_s14, %s3080_s19  }
 0x80b PF: > { %s3105_s16 = sand.u32 1, %s5382_s30   ;;  %p6864_p12 = scmp.ne.s32.totalorder %s6831_s28, 0 }
 0x80c   : > { %p6865_p3 = scmp.ge.s32.totalorder %s5394_s12, 2  ;;  %s3106_s22 = scalar_lea.sflag [#allocation4], %s3105_s16 }
 0x80e   : > { %p5120_p13 = pnand %p6865_p3, %p6864_p12 }
 0x810   : > { %5377 = dma.done.wait (!%p5120_p13), %s3106_s22, 128  }
 0x811   : > { %5379 = vsyncadd (!%p5120_p13), %s3106_s22, 4294967168  ;;  %p24_p0 = scmp.ge.s32.totalorder %s5609_s27, 4   ;;  %s6866_s30 = smov %s5386_s10 }
 0x812   : > { %s6867_s10 = smov %s5390_s11  ;;  %s6868_s11 = smov %s5620_s25 }
 0x813   : > { %s6869_s12 = smov %s5609_s27  ;;  %26 = sbr.rel (!%p24_p0) target bundleno = 10 (0xa), region = 117 }
 0x81a   :  { %3111 = vsyncpa [#allocation3], 1 }
 0x81b   :  { %3113 = vsyncpa [#allocation3 + $0x1], 1 }
 0x81c   :  { %3114 = vsyncpa [#allocation6], 1 }
 0x81d   :  { %3115 = vsyncpa [#allocation9], 1 }
 0x81e   :  { %3116 = vsyncpa [#allocation4], 1 }
 0x81f   :  { %3118 = vsyncpa [#allocation4 + $0x1], 1 }

</bundles_post_ra>
